<compile_context>
chip_gen: v5e
topology: v5e:2x2
jax: 0.10.0
libtpu: 0.0.40
codegen_flags: <defaults>
</compile_context>

<pallas_src>
import functools

import jax
import jax.numpy as jnp
from jax.experimental import pallas as pl
from jax.experimental.pallas import tpu as pltpu


def _round_up(x, m):
    return ((x + m - 1) // m) * m


def _pick_tile_m(M, target=1024):
    """Pick a row tile: prefer a divisor of M (no pad / no out[:M] slice),
    a multiple of 8, <= target, and >= 4 grid steps when M is large enough
    (v7x has 2 TensorCores; pipelining needs multiple steps)."""
    if M <= 256:                       # tiny: one block (block dim == array dim)
        return M, M
    cap = max(64, min(target, M // 4))
    cap -= cap % 8
    for tm in range(cap, 63, -8):
        if M % tm == 0:
            return tm, M
    # Rare fallback: no clean divisor -> pad rows; caller slices them back out.
    return cap, _round_up(M, cap)


def _block_diag(w, pack):
    """(K, C) -> block-diagonal (pack*K, pack*C): block j maps input rows
    [j*K,(j+1)*K) to output cols [j*C,(j+1)*C).  Tiny, built at trace time."""
    K, C = w.shape
    eye = jnp.eye(pack, dtype=w.dtype)
    return jnp.einsum("jl,kc->jklc", eye, w).reshape(pack * K, pack * C)


# ---------------------------------------------------------------------------
# Pallas kernel: tiled (M, K) @ (K, Cout) on the MXU (f32 accumulate), fused
# per-channel shift (folded BN / bias) + optional ReLU epilogue in f32.
# ---------------------------------------------------------------------------
def _matmul_bias_act_kernel(relu, x_ref, w_ref, shift_ref, o_ref):
    acc = jnp.dot(x_ref[...], w_ref[...], preferred_element_type=jnp.float32)
    y = acc + shift_ref[...]
    if relu:
        y = jnp.maximum(y, 0.0)
    o_ref[...] = y.astype(o_ref.dtype)


def matmul_bias_act(x, w, shift, *, relu, tile_m=1024, out_dtype=jnp.bfloat16):
    """[relu](x @ w + shift), M-tiled, bf16 operands / f32 accumulation.

    When Cout < 128, `pack = 128 // Cout` consecutive rows are packed into one
    128-lane output row via a block-diagonal weight, so stores and the f32
    epilogue are lane-dense.  All reshapes involved are contiguous (free).
    """
    M, K = x.shape
    Kw, Cout = w.shape
    assert K == Kw and shift.shape == (1, Cout)

    pack = 1
    if Cout < 128 and 128 % Cout == 0:
        pack = 128 // Cout
        while pack > 1 and M % pack != 0:
            pack //= 2
    if pack > 1:
        w = _block_diag(w, pack)                 # (pack*K, pack*Cout)
        shift = jnp.tile(shift, (1, pack))       # (1, pack*Cout)
    Mp, Kp, Cp = M // pack, pack * K, pack * Cout

    xb = x.reshape(Mp, Kp).astype(jnp.bfloat16)  # contiguous reshape: free
    wb = w.astype(jnp.bfloat16)
    shift = shift.astype(jnp.float32)

    tm, Mp_pad = _pick_tile_m(Mp, tile_m)
    if Mp_pad != Mp:
        xb = jnp.pad(xb, ((0, Mp_pad - Mp), (0, 0)))

    out = pl.pallas_call(
        functools.partial(_matmul_bias_act_kernel, relu),
        out_shape=jax.ShapeDtypeStruct((Mp_pad, Cp), out_dtype),
        grid=(Mp_pad // tm,),
        in_specs=[
            # Full-extent K / Cout blocks: legal (block dim == array dim); the
            # non-128-multiple lane dim is padded in VMEM only, no HBM copy.
            pl.BlockSpec((tm, Kp), lambda i: (i, 0)),    # x: tiled over rows
            pl.BlockSpec((Kp, Cp), lambda i: (0, 0)),    # w: VMEM-resident
            pl.BlockSpec((1, Cp), lambda i: (0, 0)),     # shift
        ],
        out_specs=pl.BlockSpec((tm, Cp), lambda i: (i, 0)),
        compiler_params=pltpu.CompilerParams(
            dimension_semantics=("parallel",),
            vmem_limit_bytes=32 * 1024 * 1024,           # safe on v5e/v6e/v7x
        ),
    )(xb, wb, shift)

    if Mp_pad != Mp:                                     # rare fallback only
        out = out[:Mp]
    return out.reshape(M, Cout)                          # contiguous: free


# ---------------------------------------------------------------------------
# Pallas kernel: adaptive avgpool(1,1) + fc in one pass.  Spatial mean is done
# in-kernel in f32 (no S-times tiled weight), then one (tn,C)@(C,D) matmul.
# ---------------------------------------------------------------------------
def _avgpool_fc_kernel(x_ref, w_ref, b_ref, o_ref):
    xm = jnp.mean(x_ref[...].astype(jnp.float32), axis=1)       # (tn, C)
    acc = jnp.dot(xm.astype(jnp.bfloat16), w_ref[...],
                  preferred_element_type=jnp.float32)
    o_ref[...] = (acc + b_ref[...]).astype(o_ref.dtype)


def avgpool_fc(x, w, b, *, tile_n=128):
    """mean_s(x) @ w + b  for x of shape (N, S, C); output f32 (N, D)."""
    N, S, C = x.shape
    Cw, D = w.shape
    assert C == Cw and b.shape == (1, D)

    tn, N_pad = _pick_tile_m(N, tile_n)
    xb = x.astype(jnp.bfloat16)
    if N_pad != N:
        xb = jnp.pad(xb, ((0, N_pad - N), (0, 0), (0, 0)))

    out = pl.pallas_call(
        _avgpool_fc_kernel,
        out_shape=jax.ShapeDtypeStruct((N_pad, D), jnp.float32),
        grid=(N_pad // tn,),
        in_specs=[
            pl.BlockSpec((tn, S, C), lambda i: (i, 0, 0)),
            pl.BlockSpec((C, D), lambda i: (0, 0)),
            pl.BlockSpec((1, D), lambda i: (0, 0)),
        ],
        out_specs=pl.BlockSpec((tn, D), lambda i: (i, 0)),
        compiler_params=pltpu.CompilerParams(
            dimension_semantics=("parallel",),
            vmem_limit_bytes=32 * 1024 * 1024,
        ),
    )(xb, w.astype(jnp.bfloat16), b.astype(jnp.float32))
    return out[:N] if N_pad != N else out


# ---------------------------------------------------------------------------
# Plain-JAX glue: im2col patch extraction, maxpool (running max), BN folding.
# ---------------------------------------------------------------------------
def _extract_patches(x, k, s, p):
    """x: (N, H, W, C) -> (N, OH, OW, k*k, C), tap order (kh, kw)."""
    N, H, W, C = x.shape
    OH = (H + 2 * p - k) // s + 1
    OW = (W + 2 * p - k) // s + 1
    xp = jnp.pad(x, ((0, 0), (p, p), (p, p), (0, 0)))
    taps = [
        xp[:, kh:kh + (OH - 1) * s + 1:s, kw:kw + (OW - 1) * s + 1:s, :]
        for kh in range(k) for kw in range(k)
    ]
    return jnp.stack(taps, axis=3), OH, OW


def maxpool_3x3_s2_p1(x):
    """MaxPool2d(k=3, s=2, p=1) as a running max over 9 strided taps.
    0-padding is valid because inputs are post-ReLU (>= 0)."""
    N, H, W, C = x.shape
    OH = (H + 2 - 3) // 2 + 1
    OW = (W + 2 - 3) // 2 + 1
    xp = jnp.pad(x, ((0, 0), (1, 1), (1, 1), (0, 0)))
    out = None
    for kh in range(3):
        for kw in range(3):
            tap = xp[:, kh:kh + 2 * (OH - 1) + 1:2,
                     kw:kw + 2 * (OW - 1) + 1:2, :]
            out = tap if out is None else jnp.maximum(out, tap)
    return out


def _fold_bn(gamma, beta, mean, var, eps=1e-5):
    scale = gamma / jnp.sqrt(var + eps)
    shift = beta - mean * scale
    return scale[None, :], shift[None, :]


def init_params(key, output_dim=128):
    ks = jax.random.split(key, 16)
    params = {}
    # Conv weights stored (KH, KW, Cin, Cout) to match im2col tap ordering.
    params["w1"] = jax.random.normal(ks[0], (7, 7, 3, 32), jnp.float32) * 0.05
    params["w2"] = jax.random.normal(ks[1], (3, 3, 32, 64), jnp.float32) * 0.05
    params["w3"] = jax.random.normal(ks[2], (3, 3, 64, 128), jnp.float32) * 0.05

    def bn(i, c):
        gamma = jax.random.uniform(ks[3 + 4 * i], (c,), jnp.float32, 0.5, 1.5)
        beta = jax.random.normal(ks[4 + 4 * i], (c,), jnp.float32) * 0.1
        mean = jax.random.normal(ks[5 + 4 * i], (c,), jnp.float32) * 0.1
        var = jax.random.uniform(ks[6 + 4 * i], (c,), jnp.float32, 0.5, 1.5)
        return _fold_bn(gamma, beta, mean, var)

    params["s1"], params["b1"] = bn(0, 32)
    params["s2"], params["b2"] = bn(1, 64)
    params["s3"], params["b3"] = bn(2, 128)

    params["wfc"] = jax.random.normal(ks[15], (128, output_dim), jnp.float32) * 0.05
    params["bfc"] = (
        jax.random.normal(jax.random.fold_in(key, 99), (output_dim,), jnp.float32)
        * 0.05
    )[None, :]
    return params


# ---------------------------------------------------------------------------
# Forward pass
# ---------------------------------------------------------------------------
def rgb_encoder_forward(x, params):
    B, F, H, W, C = x.shape
    N = B * F
    y = x.reshape(N, H, W, C).astype(jnp.bfloat16)   # NHWC, bf16 activations

    # conv1 (k7, s2, p3) + bn1 + relu  (BN scale folded into weight columns)
    p, OH, OW = _extract_patches(y, 7, 2, 3)
    w1 = params["w1"].reshape(7 * 7 * C, 32) * params["s1"]
    y = matmul_bias_act(p.reshape(N * OH * OW, 7 * 7 * C), w1, params["b1"],
                        relu=True).reshape(N, OH, OW, 32)

    # maxpool (k3, s2, p1)
    y = maxpool_3x3_s2_p1(y)

    # conv2 (k3, s2, p1) + bn2 + relu
    p, OH, OW = _extract_patches(y, 3, 2, 1)
    w2 = params["w2"].reshape(9 * 32, 64) * params["s2"]
    y = matmul_bias_act(p.reshape(N * OH * OW, 9 * 32), w2, params["b2"],
                        relu=True).reshape(N, OH, OW, 64)

    # conv3 (k3, s2, p1) + bn3 + relu
    p, OH, OW = _extract_patches(y, 3, 2, 1)
    w3 = params["w3"].reshape(9 * 64, 128) * params["s3"]
    y = matmul_bias_act(p.reshape(N * OH * OW, 9 * 64), w3, params["b3"],
                        relu=True).reshape(N, OH, OW, 128)

    # adaptive avgpool (1,1) + flatten + fc in one Pallas kernel (mean over the
    # spatial axis in-kernel; weight stays (128, D), independent of S).
    out = avgpool_fc(y.reshape(N, OH * OW, 128), params["wfc"], params["bfc"])

    # (B*F, D) -> (B, F, D) -> transpose(1, 2) -> (B, D, F)
    out = out.reshape(B, F, -1)
    return jnp.transpose(out, (0, 2, 1))


if __name__ == "__main__":
    key = jax.random.PRNGKey(0)
    k_in, k_par = jax.random.split(key)

    # Small but non-degenerate: conv1 runs a 4-step parallel grid
    # (M=4096 rows, pack=4 -> 1024 packed rows, tile 256) and the
    # avgpool/fc kernel sees S=16 spatial positions.
    B, F, H, W, C = 2, 2, 64, 64, 3
    x = jax.random.normal(k_in, (B, F, H, W, C), jnp.float32)
    params = init_params(k_par, output_dim=128)

    fwd = jax.jit(rgb_encoder_forward)
    out = jax.block_until_ready(fwd(x, params))

    assert out.shape == (B, 128, F), out.shape
    assert jnp.all(jnp.isfinite(out))
    print("KERNEL_OK")
</pallas_src>

<mosaic_0001>
module attributes {stable_mosaic.version = 11 : i64} {
  func.func @_matmul_bias_act_kernel(%arg0: i32, %arg1: memref<256x588xbf16, #tpu.memory_space<vmem>>, %arg2: memref<588x128xbf16, #tpu.memory_space<vmem>>, %arg3: memref<1x128xf32, #tpu.memory_space<vmem>>, %arg4: memref<256x128xbf16, #tpu.memory_space<vmem>>) attributes {dimension_semantics = [#tpu.dimension_semantics<parallel>], iteration_bounds = array<i64: 4>, scalar_prefetch = 0 : i64, scratch_operands = 0 : i64, tpu.core_type = #tpu.core_type<tc>, window_params = [{transform_indices = @transform_0, window_bounds = array<i64: 256, 588>}, {pipeline_mode = #tpu.pipeline_mode<synchronous>, transform_indices = @transform_1, window_bounds = array<i64: 588, 128>}, {pipeline_mode = #tpu.pipeline_mode<synchronous>, transform_indices = @transform_2, window_bounds = array<i64: 1, 128>}, {transform_indices = @transform_3, window_bounds = array<i64: 256, 128>}]} {
    %c0 = arith.constant 0 : index
    %c0_0 = arith.constant 0 : index
    %0 = vector.load %arg1[%c0, %c0_0] : memref<256x588xbf16, #tpu.memory_space<vmem>>, vector<256x588xbf16>
    %c0_1 = arith.constant 0 : index
    %c0_2 = arith.constant 0 : index
    %1 = vector.load %arg2[%c0_1, %c0_2] : memref<588x128xbf16, #tpu.memory_space<vmem>>, vector<588x128xbf16>
    %cst = arith.constant dense<0.000000e+00> : vector<256x128xf32>
    %2 = tpu.matmul %0, %1, %cst {dimension_numbers = #tpu.dot_dimension_numbers<[1], [0], [0], [1], [0, 0, 1, 1], [], []>} : vector<256x588xbf16>, vector<588x128xbf16>, vector<256x128xf32> -> vector<256x128xf32>
    %c0_3 = arith.constant 0 : index
    %c0_4 = arith.constant 0 : index
    %3 = vector.load %arg3[%c0_3, %c0_4] : memref<1x128xf32, #tpu.memory_space<vmem>>, vector<1x128xf32>
    %4 = vector.broadcast %3 : vector<1x128xf32> to vector<256x128xf32>
    %5 = arith.addf %2, %4 : vector<256x128xf32>
    %cst_5 = arith.constant 0.000000e+00 : f32
    %6 = vector.broadcast %cst_5 : f32 to vector<256x128xf32>
    %7 = arith.maximumf %5, %6 : vector<256x128xf32>
    %8 = arith.truncf %7 : vector<256x128xf32> to vector<256x128xbf16>
    %c0_6 = arith.constant 0 : index
    %c0_7 = arith.constant 0 : index
    %9 = vector.load %arg4[%c0_6, %c0_7] : memref<256x128xbf16, #tpu.memory_space<vmem>>, vector<256x128xbf16>
    tpu.vector_store %arg4[%c0_6, %c0_7], %8 {strides = array<i32>} : memref<256x128xbf16, #tpu.memory_space<vmem>>, vector<256x128xbf16>,
    return
  }
  func.func @transform_0(%arg0: i32) -> (i32, i32) {
    %c0_i32 = arith.constant 0 : i32
    %c0_i32_0 = arith.constant 0 : i32
    return %arg0, %c0_i32 : i32, i32
  }
  func.func @transform_1(%arg0: i32) -> (i32, i32) {
    %c0_i32 = arith.constant 0 : i32
    %c0_i32_0 = arith.constant 0 : i32
    %c0_i32_1 = arith.constant 0 : i32
    return %c0_i32, %c0_i32_0 : i32, i32
  }
  func.func @transform_2(%arg0: i32) -> (i32, i32) {
    %c0_i32 = arith.constant 0 : i32
    %c0_i32_0 = arith.constant 0 : i32
    %c0_i32_1 = arith.constant 0 : i32
    return %c0_i32, %c0_i32_0 : i32, i32
  }
  func.func @transform_3(%arg0: i32) -> (i32, i32) {
    %c0_i32 = arith.constant 0 : i32
    %c0_i32_0 = arith.constant 0 : i32
    return %arg0, %c0_i32 : i32, i32
  }
}

module attributes {stable_mosaic.version = 11 : i64} {
  func.func @_matmul_bias_act_kernel(%arg0: i32, %arg1: memref<128x576xbf16, #tpu.memory_space<vmem>>, %arg2: memref<576x128xbf16, #tpu.memory_space<vmem>>, %arg3: memref<1x128xf32, #tpu.memory_space<vmem>>, %arg4: memref<128x128xbf16, #tpu.memory_space<vmem>>) attributes {dimension_semantics = [#tpu.dimension_semantics<parallel>], iteration_bounds = array<i64: 1>, scalar_prefetch = 0 : i64, scratch_operands = 0 : i64, tpu.core_type = #tpu.core_type<tc>, window_params = [{transform_indices = @transform_0, window_bounds = array<i64: 128, 576>}, {pipeline_mode = #tpu.pipeline_mode<synchronous>, transform_indices = @transform_1, window_bounds = array<i64: 576, 128>}, {pipeline_mode = #tpu.pipeline_mode<synchronous>, transform_indices = @transform_2, window_bounds = array<i64: 1, 128>}, {transform_indices = @transform_3, window_bounds = array<i64: 128, 128>}]} {
    %c0 = arith.constant 0 : index
    %c0_0 = arith.constant 0 : index
    %0 = vector.load %arg1[%c0, %c0_0] : memref<128x576xbf16, #tpu.memory_space<vmem>>, vector<128x576xbf16>
    %c0_1 = arith.constant 0 : index
    %c0_2 = arith.constant 0 : index
    %1 = vector.load %arg2[%c0_1, %c0_2] : memref<576x128xbf16, #tpu.memory_space<vmem>>, vector<576x128xbf16>
    %cst = arith.constant dense<0.000000e+00> : vector<128x128xf32>
    %2 = tpu.matmul %0, %1, %cst {dimension_numbers = #tpu.dot_dimension_numbers<[1], [0], [0], [1], [0, 0, 1, 1], [], []>} : vector<128x576xbf16>, vector<576x128xbf16>, vector<128x128xf32> -> vector<128x128xf32>
    %c0_3 = arith.constant 0 : index
    %c0_4 = arith.constant 0 : index
    %3 = vector.load %arg3[%c0_3, %c0_4] : memref<1x128xf32, #tpu.memory_space<vmem>>, vector<1x128xf32>
    %4 = vector.broadcast %3 : vector<1x128xf32> to vector<128x128xf32>
    %5 = arith.addf %2, %4 : vector<128x128xf32>
    %cst_5 = arith.constant 0.000000e+00 : f32
    %6 = vector.broadcast %cst_5 : f32 to vector<128x128xf32>
    %7 = arith.maximumf %5, %6 : vector<128x128xf32>
    %8 = arith.truncf %7 : vector<128x128xf32> to vector<128x128xbf16>
    %c0_6 = arith.constant 0 : index
    %c0_7 = arith.constant 0 : index
    %9 = vector.load %arg4[%c0_6, %c0_7] : memref<128x128xbf16, #tpu.memory_space<vmem>>, vector<128x128xbf16>
    tpu.vector_store %arg4[%c0_6, %c0_7], %8 {strides = array<i32>} : memref<128x128xbf16, #tpu.memory_space<vmem>>, vector<128x128xbf16>,
    return
  }
  func.func @transform_0(%arg0: i32) -> (i32, i32) {
    %c0_i32 = arith.constant 0 : i32
    %c0_i32_0 = arith.constant 0 : i32
    return %arg0, %c0_i32 : i32, i32
  }
  func.func @transform_1(%arg0: i32) -> (i32, i32) {
    %c0_i32 = arith.constant 0 : i32
    %c0_i32_0 = arith.constant 0 : i32
    %c0_i32_1 = arith.constant 0 : i32
    return %c0_i32, %c0_i32_0 : i32, i32
  }
  func.func @transform_2(%arg0: i32) -> (i32, i32) {
    %c0_i32 = arith.constant 0 : i32
    %c0_i32_0 = arith.constant 0 : i32
    %c0_i32_1 = arith.constant 0 : i32
    return %c0_i32, %c0_i32_0 : i32, i32
  }
  func.func @transform_3(%arg0: i32) -> (i32, i32) {
    %c0_i32 = arith.constant 0 : i32
    %c0_i32_0 = arith.constant 0 : i32
    return %arg0, %c0_i32 : i32, i32
  }
}

module attributes {stable_mosaic.version = 11 : i64} {
  func.func @_matmul_bias_act_kernel(%arg0: i32, %arg1: memref<64x576xbf16, #tpu.memory_space<vmem>>, %arg2: memref<576x128xbf16, #tpu.memory_space<vmem>>, %arg3: memref<1x128xf32, #tpu.memory_space<vmem>>, %arg4: memref<64x128xbf16, #tpu.memory_space<vmem>>) attributes {dimension_semantics = [#tpu.dimension_semantics<parallel>], iteration_bounds = array<i64: 1>, scalar_prefetch = 0 : i64, scratch_operands = 0 : i64, tpu.core_type = #tpu.core_type<tc>, window_params = [{transform_indices = @transform_0, window_bounds = array<i64: 64, 576>}, {pipeline_mode = #tpu.pipeline_mode<synchronous>, transform_indices = @transform_1, window_bounds = array<i64: 576, 128>}, {pipeline_mode = #tpu.pipeline_mode<synchronous>, transform_indices = @transform_2, window_bounds = array<i64: 1, 128>}, {transform_indices = @transform_3, window_bounds = array<i64: 64, 128>}]} {
    %c0 = arith.constant 0 : index
    %c0_0 = arith.constant 0 : index
    %0 = vector.load %arg1[%c0, %c0_0] : memref<64x576xbf16, #tpu.memory_space<vmem>>, vector<64x576xbf16>
    %c0_1 = arith.constant 0 : index
    %c0_2 = arith.constant 0 : index
    %1 = vector.load %arg2[%c0_1, %c0_2] : memref<576x128xbf16, #tpu.memory_space<vmem>>, vector<576x128xbf16>
    %cst = arith.constant dense<0.000000e+00> : vector<64x128xf32>
    %2 = tpu.matmul %0, %1, %cst {dimension_numbers = #tpu.dot_dimension_numbers<[1], [0], [0], [1], [0, 0, 1, 1], [], []>} : vector<64x576xbf16>, vector<576x128xbf16>, vector<64x128xf32> -> vector<64x128xf32>
    %c0_3 = arith.constant 0 : index
    %c0_4 = arith.constant 0 : index
    %3 = vector.load %arg3[%c0_3, %c0_4] : memref<1x128xf32, #tpu.memory_space<vmem>>, vector<1x128xf32>
    %4 = vector.broadcast %3 : vector<1x128xf32> to vector<64x128xf32>
    %5 = arith.addf %2, %4 : vector<64x128xf32>
    %cst_5 = arith.constant 0.000000e+00 : f32
    %6 = vector.broadcast %cst_5 : f32 to vector<64x128xf32>
    %7 = arith.maximumf %5, %6 : vector<64x128xf32>
    %8 = arith.truncf %7 : vector<64x128xf32> to vector<64x128xbf16>
    %c0_6 = arith.constant 0 : index
    %c0_7 = arith.constant 0 : index
    %9 = vector.load %arg4[%c0_6, %c0_7] : memref<64x128xbf16, #tpu.memory_space<vmem>>, vector<64x128xbf16>
    tpu.vector_store %arg4[%c0_6, %c0_7], %8 {strides = array<i32>} : memref<64x128xbf16, #tpu.memory_space<vmem>>, vector<64x128xbf16>,
    return
  }
  func.func @transform_0(%arg0: i32) -> (i32, i32) {
    %c0_i32 = arith.constant 0 : i32
    %c0_i32_0 = arith.constant 0 : i32
    return %arg0, %c0_i32 : i32, i32
  }
  func.func @transform_1(%arg0: i32) -> (i32, i32) {
    %c0_i32 = arith.constant 0 : i32
    %c0_i32_0 = arith.constant 0 : i32
    %c0_i32_1 = arith.constant 0 : i32
    return %c0_i32, %c0_i32_0 : i32, i32
  }
  func.func @transform_2(%arg0: i32) -> (i32, i32) {
    %c0_i32 = arith.constant 0 : i32
    %c0_i32_0 = arith.constant 0 : i32
    %c0_i32_1 = arith.constant 0 : i32
    return %c0_i32, %c0_i32_0 : i32, i32
  }
  func.func @transform_3(%arg0: i32) -> (i32, i32) {
    %c0_i32 = arith.constant 0 : i32
    %c0_i32_0 = arith.constant 0 : i32
    return %arg0, %c0_i32 : i32, i32
  }
}

module attributes {stable_mosaic.version = 11 : i64} {
  func.func @_avgpool_fc_kernel(%arg0: i32, %arg1: memref<4x16x128xbf16, #tpu.memory_space<vmem>>, %arg2: memref<128x128xbf16, #tpu.memory_space<vmem>>, %arg3: memref<1x128xf32, #tpu.memory_space<vmem>>, %arg4: memref<4x128xf32, #tpu.memory_space<vmem>>) attributes {dimension_semantics = [#tpu.dimension_semantics<parallel>], iteration_bounds = array<i64: 1>, scalar_prefetch = 0 : i64, scratch_operands = 0 : i64, tpu.core_type = #tpu.core_type<tc>, window_params = [{transform_indices = @transform_0, window_bounds = array<i64: 4, 16, 128>}, {pipeline_mode = #tpu.pipeline_mode<synchronous>, transform_indices = @transform_1, window_bounds = array<i64: 128, 128>}, {pipeline_mode = #tpu.pipeline_mode<synchronous>, transform_indices = @transform_2, window_bounds = array<i64: 1, 128>}, {transform_indices = @transform_3, window_bounds = array<i64: 4, 128>}]} {
    %c0 = arith.constant 0 : index
    %c0_0 = arith.constant 0 : index
    %c0_1 = arith.constant 0 : index
    %0 = vector.load %arg1[%c0, %c0_0, %c0_1] : memref<4x16x128xbf16, #tpu.memory_space<vmem>>, vector<4x16x128xbf16>
    %1 = arith.extf %0 : vector<4x16x128xbf16> to vector<4x16x128xf32>
    %cst = arith.constant dense<0.000000e+00> : vector<4x128xf32>
    %2 = vector.multi_reduction <add>, %1, %cst [1] : vector<4x16x128xf32> to vector<4x128xf32>
    %cst_2 = arith.constant 1.600000e+01 : f32
    %3 = vector.broadcast %cst_2 : f32 to vector<4x128xf32>
    %4 = arith.divf %2, %3 : vector<4x128xf32>
    %5 = arith.truncf %4 : vector<4x128xf32> to vector<4x128xbf16>
    %c0_3 = arith.constant 0 : index
    %c0_4 = arith.constant 0 : index
    %6 = vector.load %arg2[%c0_3, %c0_4] : memref<128x128xbf16, #tpu.memory_space<vmem>>, vector<128x128xbf16>
    %cst_5 = arith.constant dense<0.000000e+00> : vector<4x128xf32>
    %7 = tpu.matmul %5, %6, %cst_5 {dimension_numbers = #tpu.dot_dimension_numbers<[1], [0], [0], [1], [0, 0, 1, 1], [], []>} : vector<4x128xbf16>, vector<128x128xbf16>, vector<4x128xf32> -> vector<4x128xf32>
    %c0_6 = arith.constant 0 : index
    %c0_7 = arith.constant 0 : index
    %8 = vector.load %arg3[%c0_6, %c0_7] : memref<1x128xf32, #tpu.memory_space<vmem>>, vector<1x128xf32>
    %9 = vector.broadcast %8 : vector<1x128xf32> to vector<4x128xf32>
    %10 = arith.addf %7, %9 : vector<4x128xf32>
    %c0_8 = arith.constant 0 : index
    %c0_9 = arith.constant 0 : index
    %11 = vector.load %arg4[%c0_8, %c0_9] : memref<4x128xf32, #tpu.memory_space<vmem>>, vector<4x128xf32>
    tpu.vector_store %arg4[%c0_8, %c0_9], %10 {strides = array<i32>} : memref<4x128xf32, #tpu.memory_space<vmem>>, vector<4x128xf32>,
    return
  }
  func.func @transform_0(%arg0: i32) -> (i32, i32, i32) {
    %c0_i32 = arith.constant 0 : i32
    %c0_i32_0 = arith.constant 0 : i32
    %c0_i32_1 = arith.constant 0 : i32
    return %arg0, %c0_i32, %c0_i32_0 : i32, i32, i32
  }
  func.func @transform_1(%arg0: i32) -> (i32, i32) {
    %c0_i32 = arith.constant 0 : i32
    %c0_i32_0 = arith.constant 0 : i32
    %c0_i32_1 = arith.constant 0 : i32
    return %c0_i32, %c0_i32_0 : i32, i32
  }
  func.func @transform_2(%arg0: i32) -> (i32, i32) {
    %c0_i32 = arith.constant 0 : i32
    %c0_i32_0 = arith.constant 0 : i32
    %c0_i32_1 = arith.constant 0 : i32
    return %c0_i32, %c0_i32_0 : i32, i32
  }
  func.func @transform_3(%arg0: i32) -> (i32, i32) {
    %c0_i32 = arith.constant 0 : i32
    %c0_i32_0 = arith.constant 0 : i32
    return %arg0, %c0_i32 : i32, i32
  }
}

</mosaic_0001>

<bundles_post_ra>
// kernel: rgb_encoder_forward.4
= control target key start
LH: loop header
LB: loop body
LE: loop exit
PB: predicated region body
PF: predicated region fallthrough
CT: control target
= control target key end

     0   :  { %s2392_s12 = smov 0   ;;  %s2856_s0 = inlined_call_operand.vmem [shape: bf16[1024,588], index: 0, kind: input, shape index: {}]   ;;  %s2857_s1 = inlined_call_operand.vmem [shape: bf16[588,128], index: 1, kind: input, shape index: {}]   ;;  %s2858_s2 = inlined_call_operand.vmem [shape: f32[1,128], index: 2, kind: input, shape index: {}]   ;;  %s2859_s3 = inlined_call_operand.vmem [shape: bf16[1024,128], index: 3, kind: output, shape index: {}]  }
   0x1 LB: > { %s1623_s13 = sadd.s32 4294967295, %s2370_s12   ;;  %p1627_p0 = scmp.ge.s32.totalorder %s2370_s12, 1  ;;  %s2370_s12 = sphi %s2392_s12, %s13_s12  }
   0x2   : > { %p139_p1 = scmp.lt.s32.totalorder %s2370_s12, 5 }
   0x4   : > { %p140_p2 = pnand %p1627_p0, %p139_p1 }
   0x5   : > { %s1628_s20 = sshll.u32 (!%p140_p2), %s1623_s13, 5 }
   0x6   : > { %143 = sbr.rel (%p140_p2) target bundleno = 498 (0x1f2), region = 32  ;;  %p165_p3 = scmp.lt.s32.totalorder (!%p140_p2), %s1628_s20, 127 }
   0xb   : > { %v2205_v0 = vld [vmem:[%s2857_s1 + $0x38] sm:$0xff]  ;;  %v2204_v1 = vld [vmem:[%s2857_s1 + $0x30] sm:$0xff]  ;;  %v2203_v2 = vld [vmem:[%s2857_s1 + $0x28] sm:$0xff]  ;;  %s2861_s20 = smov (!%p165_p3, %s1628_s20), 127  ;;  %vm1022_vm0 = vcmask 1045504   ;;  %vm973_vm1 = vcmask 621568  }
   0xc   : > { %2330 = vmatpush.bf16.msra.mxu1 %v2205_v0  ;;  %2331 = vmatpush.bf16.msra.mxu2 %v2205_v0  ;;  %v2202_v3 = vld [vmem:[%s2857_s1 + $0x20] sm:$0xff]  ;;  %v2201_v4 = vld [vmem:[%s2857_s1 + $0x18] sm:$0xff]  ;;  %v2200_v5 = vld [vmem:[%s2857_s1 + $0x10] sm:$0xff]  ;;  %s2354_s27 = smul.u32 20, %s2861_s20  ;;  %s1631_s24 = sshll.u32 %s2861_s20, 2 }
   0xd   : > { %2332 = vmatpush.bf16.msra.mxu3 %v2205_v0  ;;  %1026 = vmatpush.bf16.msra.mxu0 %v2205_v0  ;;  %v2199_v6 = vld [vmem:[%s2857_s1 + $0x8] sm:$0xff]  ;;  %v2198_v7 = vld [vmem:[%s2857_s1] sm:$0xff]  ;;  %v2221_v18 = vld [vmem:[%s2857_s1 + $0xb8] sm:$0xff]  ;;  %s2747_s20 = scalar_lea.vmem %s2859_s3, %s1631_s24 }
   0xe   : > { %s2427_s5 = scalar_lea.vmem %s2856_s0, %s2354_s27  ;;  %v2098_v8 = vld [vmem:[%s2857_s1 + $0x120] sm:$0xf]  ;;  %v2234_v11 = vld [vmem:[%s2857_s1 + $0x120] sm:$0x30]  ;;  %v2229_v19 = vld [vmem:[%s2857_s1 + $0xf8] sm:$0xff] }
   0xf   : > { %v1714_v9 = vld [vmem:[%s2427_s5 + $0xa0] sm:$0xf]  ;;  %v2140_v10 = vld [vmem:[%s2427_s5 + $0xb0] sm:$0xf0]  ;;  %v2099_v20 = vor.u32 %v2234_v11, %v2098_v8  ;;  %v2213_v25 = vld [vmem:[%s2857_s1 + $0x78] sm:$0xff] }
  0x10   : > { %2333 = vmatpush.bf16.msra.mxu1 %v2204_v1  ;;  %2334 = vmatpush.bf16.msra.mxu2 %v2204_v1  ;;  %v1794_v12 = vld [vmem:[%s2427_s5 + $0x140] sm:$0xf]  ;;  %v2160_v13 = vld [vmem:[%s2427_s5 + $0x150] sm:$0xf0]  ;;  %v1715_v21 = vor.u32 %v2140_v10, %v1714_v9  ;;  %v2233_v30 = vld [vmem:[%s2857_s1 + $0x118] sm:$0xff] }
  0x11   : > { %2335 = vmatpush.bf16.msra.mxu3 %v2204_v1  ;;  %1027 = vmatpush.bf16.msra.mxu0 %v2204_v1  ;;  %v1874_v14 = vld [vmem:[%s2427_s5 + $0x1e0] sm:$0xf]  ;;  %v2180_v15 = vld [vmem:[%s2427_s5 + $0x1f0] sm:$0xf0]  ;;  %v1795_v22 = vor.u32 %v2160_v13, %v1794_v12  ;;  %v1024_v28 = vsel %vm1022_vm0, %v2099_v20, 0  ;;  %v2219_v31 = vld [vmem:[%s2857_s1 + $0xa8] sm:$0xff] }
  0x12   : > { %v1634_v16 = vld [vmem:[%s2427_s5] sm:$0xf]  ;;  %v2120_v17 = vld [vmem:[%s2427_s5 + $0x10] sm:$0xf0]  ;;  %v1875_v23 = vor.u32 %v2180_v15, %v1874_v14  ;;  %v2227_v32 = vld [vmem:[%s2857_s1 + $0xe8] sm:$0xff] }
  0x13   : > { %v1635_v24 = vor.u32 %v2120_v17, %v1634_v16  ;;  %v2220_v26 = vld [vmem:[%s2857_s1 + $0xb0] sm:$0xff]  ;;  %v2211_v33 = vld [vmem:[%s2857_s1 + $0x68] sm:$0xff]  ;;  %v2218_v35 = vld [vmem:[%s2857_s1 + $0xa0] sm:$0xff] }
  0x14   : > { %2336 = vmatpush.bf16.msra.mxu1 %v2203_v2  ;;  %2337 = vmatpush.bf16.msra.mxu2 %v2203_v2  ;;  %v2228_v27 = vld [vmem:[%s2857_s1 + $0xf0] sm:$0xff]  ;;  %v2226_v36 = vld [vmem:[%s2857_s1 + $0xe0] sm:$0xff]  ;;  %v1734_v37 = vld [vmem:[%s2427_s5 + $0xc8] sm:$0xf] }
  0x15   : > { %2338 = vmatpush.bf16.msra.mxu3 %v2203_v2  ;;  %1028 = vmatpush.bf16.msra.mxu0 %v2203_v2  ;;  %v2212_v29 = vld [vmem:[%s2857_s1 + $0x70] sm:$0xff]  ;;  %v2145_v38 = vld [vmem:[%s2427_s5 + $0xd8] sm:$0xf0]  ;;  %v1814_v39 = vld [vmem:[%s2427_s5 + $0x168] sm:$0xf] }
  0x16   : > { %v2232_v34 = vld [vmem:[%s2857_s1 + $0x110] sm:$0xff]  ;;  %v2165_v40 = vld [vmem:[%s2427_s5 + $0x178] sm:$0xf0]  ;;  %v1894_v41 = vld [vmem:[%s2427_s5 + $0x208] sm:$0xf]  ;;  %v1735_v48 = vor.u32 %v2145_v38, %v1734_v37 }
  0x17   : > { %v2185_v42 = vld [vmem:[%s2427_s5 + $0x218] sm:$0xf0]  ;;  %v1654_v43 = vld [vmem:[%s2427_s5 + $0x28] sm:$0xf]  ;;  %v2210_v45 = vld [vmem:[%s2857_s1 + $0x60] sm:$0xff]  ;;  %v1815_v49 = vor.u32 %v2165_v40, %v1814_v39 }
  0x18   : > { %2339 = vmatpush.bf16.msra.mxu1 %v2202_v3  ;;  %2340 = vmatpush.bf16.msra.mxu2 %v2202_v3  ;;  %v2125_v44 = vld [vmem:[%s2427_s5 + $0x38] sm:$0xf0]  ;;  %v1895_v50 = vor.u32 %v2185_v42, %v1894_v41  ;;  %v2216_v53 = vld [vmem:[%s2857_s1 + $0x90] sm:$0xff]  ;;  %v2231_v55 = vld [vmem:[%s2857_s1 + $0x108] sm:$0xff] }
  0x19   : > { %2341 = vmatpush.bf16.msra.mxu3 %v2202_v3  ;;  %1029 = vmatpush.bf16.msra.mxu0 %v2202_v3  ;;  %v2217_v46 = vld [vmem:[%s2857_s1 + $0x98] sm:$0xff]  ;;  %v1655_v51 = vor.u32 %v2125_v44, %v1654_v43  ;;  %v2224_v54 = vld [vmem:[%s2857_s1 + $0xd0] sm:$0xff]  ;;  %v2215_v57 = vld [vmem:[%s2857_s1 + $0x88] sm:$0xff] }
  0x1a   : > { %v2225_v47 = vld [vmem:[%s2857_s1 + $0xd8] sm:$0xff]  ;;  %v2208_v56 = vld [vmem:[%s2857_s1 + $0x50] sm:$0xff]  ;;  %v2223_v58 = vld [vmem:[%s2857_s1 + $0xc8] sm:$0xff] }
  0x1b   : > { %v2209_v52 = vld [vmem:[%s2857_s1 + $0x58] sm:$0xff]  ;;  %v2230_v59 = vld [vmem:[%s2857_s1 + $0x100] sm:$0xff]  ;;  %v2207_v60 = vld [vmem:[%s2857_s1 + $0x48] sm:$0xff] }
  0x1c   : > { %2342 = vmatpush.bf16.msra.mxu1 %v2201_v4  ;;  %2343 = vmatpush.bf16.msra.mxu2 %v2201_v4  ;;  %v2214_v61 = vld [vmem:[%s2857_s1 + $0x80] sm:$0xff]  ;;  %v1754_v63 = vld [vmem:[%s2427_s5 + $0xf0] sm:$0xf]  ;;  %v1774_v12 = vld [vmem:[%s2427_s5 + $0x118] sm:$0xf] }
  0x1d   : > { %2344 = vmatpush.bf16.msra.mxu3 %v2201_v4  ;;  %1030 = vmatpush.bf16.msra.mxu0 %v2201_v4  ;;  %v2222_v62 = vld [vmem:[%s2857_s1 + $0xc0] sm:$0xff]  ;;  %v1834_v1 = vld [vmem:[%s2427_s5 + $0x190] sm:$0xf]  ;;  %v2155_v13 = vld [vmem:[%s2427_s5 + $0x128] sm:$0xf0] }
  0x1e   : > { %v2150_v0 = vld [vmem:[%s2427_s5 + $0x100] sm:$0xf0]  ;;  %v1914_v3 = vld [vmem:[%s2427_s5 + $0x230] sm:$0xf]  ;;  %v1854_v14 = vld [vmem:[%s2427_s5 + $0x1b8] sm:$0xf]  ;;  %v1775_v20 = vor.u32 %v2155_v13, %v1774_v12 }
  0x1f   : > { %v2170_v2 = vld [vmem:[%s2427_s5 + $0x1a0] sm:$0xf0]  ;;  %v1755_v8 = vor.u32 %v2150_v0, %v1754_v63  ;;  %v2175_v15 = vld [vmem:[%s2427_s5 + $0x1c8] sm:$0xf0]  ;;  %v1934_v16 = vld [vmem:[%s2427_s5 + $0x258] sm:$0xf] }
  0x20   : > { %2345 = vmatpush.bf16.msra.mxu1 %v2200_v5  ;;  %2346 = vmatpush.bf16.msra.mxu2 %v2200_v5  ;;  %v2190_v4 = vld [vmem:[%s2427_s5 + $0x240] sm:$0xf0]  ;;  %v1835_v9 = vor.u32 %v2170_v2, %v1834_v1  ;;  %v2195_v17 = vld [vmem:[%s2427_s5 + $0x268] sm:$0xf0]  ;;  %v1656_v37 = vld [vmem:[%s2427_s5 + $0x3c] sm:$0xf0] }
  0x21   : > { %2347 = vmatpush.bf16.msra.mxu3 %v2200_v5  ;;  %1031 = vmatpush.bf16.msra.mxu0 %v2200_v5  ;;  %v1674_v5 = vld [vmem:[%s2427_s5 + $0x50] sm:$0xf]  ;;  %v1915_v10 = vor.u32 %v2190_v4, %v1914_v3  ;;  %v2126_v39 = vld [vmem:[%s2427_s5 + $0x40] sm:$0xf0]  ;;  %v2124_v40 = vld [vmem:[%s2427_s5 + $0x34] sm:$0xf] }
  0x22   : > { %v1662_v38 = vld [vmem:[%s2427_s5 + $0x30] sm:$0xf]  ;;  %v1664_v41 = vld [vmem:[%s2427_s5 + $0x44] sm:$0xf0]  ;;  %v1670_v42 = vld [vmem:[%s2427_s5 + $0x38] sm:$0xf] }
  0x23   : > { %v2127_v43 = vld [vmem:[%s2427_s5 + $0x48] sm:$0xf0]  ;;  %v2136_v63 = vld [vmem:[%s2427_s5 + $0x90] sm:$0xf0]  ;;  %v2134_v0 = vld [vmem:[%s2427_s5 + $0x84] sm:$0xf] }
  0x24   : > { %2348 = vmatpush.bf16.msra.mxu1 %v2199_v6  ;;  %2349 = vmatpush.bf16.msra.mxu2 %v2199_v6  ;;  %v1704_v1 = vld [vmem:[%s2427_s5 + $0x94] sm:$0xf0]  ;;  %v1710_v2 = vld [vmem:[%s2427_s5 + $0x88] sm:$0xf]  ;;  %v2137_v3 = vld [vmem:[%s2427_s5 + $0x98] sm:$0xf0] }
  0x25   : > { %2350 = vmatpush.bf16.msra.mxu3 %v2199_v6  ;;  %1032 = vmatpush.bf16.msra.mxu0 %v2199_v6  ;;  %v2130_v6 = vld [vmem:[%s2427_s5 + $0x60] sm:$0xf0]  ;;  %v2141_v12 = vld [vmem:[%s2427_s5 + $0xb8] sm:$0xf0]  ;;  %v2139_v13 = vld [vmem:[%s2427_s5 + $0xac] sm:$0xf] }
  0x26   : > { %v1675_v11 = vor.u32 %v2130_v6, %v1674_v5  ;;  %v1707_v6 = vor.u32 %v2134_v0, %v1704_v1  ;;  %v2152_v0 = vld [vmem:[%s2427_s5 + $0x110] sm:$0xf0] }
  0x28   : > { %2351 = vmatpush.bf16.msra.mxu1 %v2198_v7  ;;  %2352 = vmatpush.bf16.msra.mxu2 %v2198_v7 }
  0x29   : > { %2353 = vmatpush.bf16.msra.mxu3 %v2198_v7  ;;  %1033 = vmatpush.bf16.msra.mxu0 %v2198_v7  ;;  %v2206_v7 = vld [vmem:[%s2857_s1 + $0x40] sm:$0xff] }
  0x2b   : > { %1054 = vmatmul.bf16.vlgmr.msra.gmra.mxu1 %v1715_v21  ;;  %1074 = vmatmul.bf16.vlgmr.msra.gmra.mxu2 %v1795_v22  ;;  %v1855_v21 = vor.u32 %v2175_v15, %v1854_v14  ;;  %v1935_v22 = vor.u32 %v2195_v17, %v1934_v16  ;;  %v1724_v14 = vld [vmem:[%s2427_s5 + $0xbc] sm:$0xf0]  ;;  %v1730_v15 = vld [vmem:[%s2427_s5 + $0xb0] sm:$0xf]  ;;  %v2142_v16 = vld [vmem:[%s2427_s5 + $0xc0] sm:$0xf0] }
  0x2c   : > { %1204 = vmatpush.bf16.msrb.mxu2 %v2221_v18  ;;  %1094 = vmatmul.bf16.vlgmr.msra.gmra.mxu3 %v1875_v23  ;;  %v1694_v18 = vld [vmem:[%s2427_s5 + $0x78] sm:$0xf] }
  0x2d   : > { %1293 = vmatpush.bf16.msrb.mxu3 %v2229_v19  ;;  %1034 = vmatmul.bf16.vlgmr.msra.gmra.mxu0 %v1635_v24  ;;  %v2135_v19 = vld [vmem:[%s2427_s5 + $0x88] sm:$0xf0]  ;;  %v2118_v24 = vld [vmem:[%s2427_s5 + $0x4] sm:$0xf] }
  0x2e   : > { %1115 = vmatpush.bf16.msrb.mxu1 %v2213_v25  ;;  %1385 = vmatpush.bf16.msrb.mxu0 %v1024_v28  ;;  %v1695_v23 = vor.u32 %v2135_v19, %v1694_v18  ;;  %v1636_v25 = vld [vmem:[%s2427_s5 + $0x14] sm:$0xf0]  ;;  %v2119_v28 = vld [vmem:[%s2427_s5 + $0xc] sm:$0xf] }
  0x30   : > { %1205 = vmatpush.bf16.msrb.mxu2 %v2220_v26  ;;  %v1642_v26 = vld [vmem:[%s2427_s5 + $0x8] sm:$0xf] }
  0x31   : > { %1294 = vmatpush.bf16.msrb.mxu3 %v2228_v27  ;;  %v2121_v27 = vld [vmem:[%s2427_s5 + $0x18] sm:$0xf0] }
  0x32   : > { %1116 = vmatpush.bf16.msrb.mxu1 %v2212_v29  ;;  %1386 = vmatpush.bf16.msrb.mxu0 %v2233_v30  ;;  %v1644_v29 = vld [vmem:[%s2427_s5 + $0x1c] sm:$0xf0]  ;;  %v1650_v30 = vld [vmem:[%s2427_s5 + $0x10] sm:$0xf] }
  0x34   : > { %1206 = vmatpush.bf16.msrb.mxu2 %v2219_v31  ;;  %v2122_v31 = vld [vmem:[%s2427_s5 + $0x20] sm:$0xf0] }
  0x35   : > { %1295 = vmatpush.bf16.msrb.mxu3 %v2227_v32  ;;  %v1639_v32 = vor.u32 %v2118_v24, %v1636_v25 }
  0x36   : > { %1117 = vmatpush.bf16.msrb.mxu1 %v2211_v33  ;;  %1387 = vmatpush.bf16.msrb.mxu0 %v2232_v34  ;;  %v1643_v33 = vor.u32 %v2121_v27, %v1642_v26  ;;  %v1647_v34 = vor.u32 %v2119_v28, %v1644_v29 }
  0x38   : > { %1207 = vmatpush.bf16.msrb.mxu2 %v2218_v35  ;;  %v1651_v35 = vor.u32 %v2122_v31, %v1650_v30  ;;  %v2143_v31 = vld [vmem:[%s2427_s5 + $0xcc] sm:$0xf] }
  0x39   : > { %1296 = vmatpush.bf16.msrb.mxu3 %v2226_v36  ;;  %v2123_v36 = vld [vmem:[%s2427_s5 + $0x2c] sm:$0xf] }
  0x3a   : > { %1118 = vmatpush.bf16.msrb.mxu1 %v2210_v45  ;;  %1388 = vmatpush.bf16.msrb.mxu0 %v2231_v55  ;;  %v1659_v44 = vor.u32 %v2123_v36, %v1656_v37  ;;  %v1663_v45 = vor.u32 %v2126_v39, %v1662_v38  ;;  %v2132_v55 = vld [vmem:[%s2427_s5 + $0x70] sm:$0xf0]  ;;  %v1744_v36 = vld [vmem:[%s2427_s5 + $0xe4] sm:$0xf0]  ;;  %v1750_v37 = vld [vmem:[%s2427_s5 + $0xd8] sm:$0xf] }
  0x3b   : > { %1059 = vmatmul.bf16.gmra.mxu1 %v1735_v48  ;;  %1079 = vmatmul.bf16.gmra.mxu2 %v1815_v49  ;;  %v2128_v48 = vld [vmem:[%s2427_s5 + $0x54] sm:$0xf]  ;;  %v1676_v49 = vld [vmem:[%s2427_s5 + $0x64] sm:$0xf0]  ;;  %v2147_v38 = vld [vmem:[%s2427_s5 + $0xe8] sm:$0xf0] }
  0x3c   : > { %1208 = vmatpush.bf16.msrb.mxu2 %v2217_v46  ;;  %1099 = vmatmul.bf16.gmra.mxu3 %v1895_v50  ;;  %v1667_v46 = vor.u32 %v2124_v40, %v1664_v41  ;;  %v1682_v50 = vld [vmem:[%s2427_s5 + $0x58] sm:$0xf] }
  0x3d   : > { %1297 = vmatpush.bf16.msrb.mxu3 %v2225_v47  ;;  %1039 = vmatmul.bf16.gmra.mxu0 %v1655_v51  ;;  %v1671_v47 = vor.u32 %v2127_v43, %v1670_v42  ;;  %v2131_v51 = vld [vmem:[%s2427_s5 + $0x68] sm:$0xf0] }
  0x3e   : > { %1119 = vmatpush.bf16.msrb.mxu1 %v2209_v52  ;;  %1389 = vmatpush.bf16.msrb.mxu0 %v2230_v59  ;;  %v2129_v52 = vld [vmem:[%s2427_s5 + $0x5c] sm:$0xf] }
  0x40   : > { %1209 = vmatpush.bf16.msrb.mxu2 %v2216_v53  ;;  %v1684_v53 = vld [vmem:[%s2427_s5 + $0x6c] sm:$0xf0] }
  0x41   : > { %1298 = vmatpush.bf16.msrb.mxu3 %v2224_v54  ;;  %v1690_v54 = vld [vmem:[%s2427_s5 + $0x60] sm:$0xf] }
  0x42   : > { %1120 = vmatpush.bf16.msrb.mxu1 %v2208_v56  ;;  %v1679_v56 = vor.u32 %v2128_v48, %v1676_v49  ;;  %v1691_v59 = vor.u32 %v2132_v55, %v1690_v54 }
  0x44   : > { %1210 = vmatpush.bf16.msrb.mxu2 %v2215_v57  ;;  %v1683_v57 = vor.u32 %v2131_v51, %v1682_v50 }
  0x45   : > { %1299 = vmatpush.bf16.msrb.mxu3 %v2223_v58  ;;  %v1687_v58 = vor.u32 %v2129_v52, %v1684_v53 }
  0x46   : > { %1121 = vmatpush.bf16.msrb.mxu1 %v2207_v60  ;;  %v2133_v60 = vld [vmem:[%s2427_s5 + $0x7c] sm:$0xf] }
  0x48   : > { %1211 = vmatpush.bf16.msrb.mxu2 %v2214_v61  ;;  %v1696_v61 = vld [vmem:[%s2427_s5 + $0x8c] sm:$0xf0] }
  0x49   : > { %1300 = vmatpush.bf16.msrb.mxu3 %v2222_v62  ;;  %v1702_v62 = vld [vmem:[%s2427_s5 + $0x80] sm:$0xf]  ;;  %v1699_v4 = vor.u32 %v2133_v60, %v1696_v61  ;;  %v2151_v60 = vld [vmem:[%s2427_s5 + $0x108] sm:$0xf0]  ;;  %v2149_v61 = vld [vmem:[%s2427_s5 + $0xfc] sm:$0xf] }
  0x4a   : > { %1122 = vmatpush.bf16.msrb.mxu1 %v2206_v7  ;;  %v1703_v5 = vor.u32 %v2136_v63, %v1702_v62  ;;  %v1711_v7 = vor.u32 %v2137_v3, %v1710_v2  ;;  %v1764_v62 = vld [vmem:[%s2427_s5 + $0x10c] sm:$0xf0]  ;;  %v1770_v63 = vld [vmem:[%s2427_s5 + $0x100] sm:$0xf] }
  0x4b   : > { %1064 = vmatmul.bf16.gmra.mxu1 %v1755_v8  ;;  %1084 = vmatmul.bf16.gmra.mxu2 %v1835_v9  ;;  %v2593_v8 = vld [vmem:[%s2858_s2] ss:$0 sm:$0xff]  ;;  %v2138_v9 = vld [vmem:[%s2427_s5 + $0xa4] sm:$0xf] }
  0x4c   : > { %1104 = vmatmul.bf16.gmra.mxu3 %v1915_v10  ;;  %v1716_v10 = vld [vmem:[%s2427_s5 + $0xb4] sm:$0xf0] }
  0x4d   : > { %1044 = vmatmul.bf16.gmra.mxu0 %v1675_v11  ;;  %v1722_v11 = vld [vmem:[%s2427_s5 + $0xa8] sm:$0xf]  ;;  %v1719_v17 = vor.u32 %v2138_v9, %v1716_v10  ;;  %v1767_v9 = vor.u32 %v2149_v61, %v1764_v62  ;;  %v1771_v10 = vor.u32 %v2152_v0, %v1770_v63  ;;  %v1796_v61 = vld [vmem:[%s2427_s5 + $0x154] sm:$0xf0]  ;;  %v2161_v63 = vld [vmem:[%s2427_s5 + $0x158] sm:$0xf0] }
  0x4e   : > { %v1723_v18 = vor.u32 %v2141_v12, %v1722_v11  ;;  %v1802_v62 = vld [vmem:[%s2427_s5 + $0x148] sm:$0xf]  ;;  %v2159_v0 = vld [vmem:[%s2427_s5 + $0x14c] sm:$0xf] }
  0x5b   : > { %1069 = vmatmul.bf16.gmra.mxu1 %v1775_v20  ;;  %1089 = vmatmul.bf16.gmra.mxu2 %v1855_v21  ;;  %v1727_v20 = vor.u32 %v2139_v13, %v1724_v14  ;;  %v1731_v21 = vor.u32 %v2142_v16, %v1730_v15 }
  0x5c   : > { %1109 = vmatmul.bf16.gmra.mxu3 %v1935_v22 }
  0x5d   : > { %1049 = vmatmul.bf16.gmra.mxu0 %v1695_v23 }
  0x6b   : > { %1123 = vmatmul.bf16.vlgmr.msrb.gmra.mxu1 %v1639_v32  ;;  %1212 = vmatmul.bf16.vlgmr.msrb.gmra.mxu2 %v1643_v33  ;;  %v1736_v32 = vld [vmem:[%s2427_s5 + $0xdc] sm:$0xf0]  ;;  %v1742_v33 = vld [vmem:[%s2427_s5 + $0xd0] sm:$0xf] }
  0x6c   : > { %1301 = vmatmul.bf16.vlgmr.msrb.gmra.mxu3 %v1647_v34  ;;  %v2146_v34 = vld [vmem:[%s2427_s5 + $0xe0] sm:$0xf0]  ;;  %v1739_v42 = vor.u32 %v2143_v31, %v1736_v32  ;;  %v1784_v31 = vld [vmem:[%s2427_s5 + $0x134] sm:$0xf0]  ;;  %v1790_v32 = vld [vmem:[%s2427_s5 + $0x128] sm:$0xf] }
  0x6d   : > { %2100 = vmatmul.msk.bf16.vlgmr.msrb.gmra.mxu0 %vm973_vm1, %v1651_v35  ;;  %v2144_v35 = vld [vmem:[%s2427_s5 + $0xd4] sm:$0xf]  ;;  %v1743_v43 = vor.u32 %v2146_v34, %v1742_v33  ;;  %v2157_v33 = vld [vmem:[%s2427_s5 + $0x138] sm:$0xf0] }
  0x7b   : > { %1128 = vmatmul.bf16.gmra.mxu1 %v1659_v44  ;;  %1217 = vmatmul.bf16.gmra.mxu2 %v1663_v45 }
  0x7c   : > { %1306 = vmatmul.bf16.gmra.mxu3 %v1667_v46  ;;  %v1747_v46 = vor.u32 %v2144_v35, %v1744_v36 }
  0x7d   : > { %2101 = vmatmul.msk.bf16.gmra.mxu0 %vm973_vm1, %v1671_v47  ;;  %v1751_v47 = vor.u32 %v2147_v38, %v1750_v37 }
  0x8b   : > { %1133 = vmatmul.bf16.gmra.mxu1 %v1679_v56  ;;  %1222 = vmatmul.bf16.gmra.mxu2 %v1683_v57  ;;  %v2148_v57 = vld [vmem:[%s2427_s5 + $0xf4] sm:$0xf] }
  0x8c   : > { %1311 = vmatmul.bf16.gmra.mxu3 %v1687_v58  ;;  %v1756_v58 = vld [vmem:[%s2427_s5 + $0x104] sm:$0xf0] }
  0x8d   : > { %2102 = vmatmul.msk.bf16.gmra.mxu0 %vm973_vm1, %v1691_v59  ;;  %v1762_v59 = vld [vmem:[%s2427_s5 + $0xf8] sm:$0xf] }
  0x9b   : > { %1138 = vmatmul.bf16.gmra.mxu1 %v1699_v4  ;;  %1227 = vmatmul.bf16.gmra.mxu2 %v1703_v5  ;;  %v1759_v4 = vor.u32 %v2148_v57, %v1756_v58  ;;  %v1763_v5 = vor.u32 %v2151_v60, %v1762_v59  ;;  %v2158_v60 = vld [vmem:[%s2427_s5 + $0x144] sm:$0xf] }
  0x9c   : > { %1316 = vmatmul.bf16.gmra.mxu3 %v1707_v6 }
  0x9d   : > { %2103 = vmatmul.msk.bf16.gmra.mxu0 %vm973_vm1, %v1711_v7 }
  0xa8   : > { %v1055_v19 = vpop.f32.mrf.mxu1 }
  0xa9   : > { %v2604_v22 = vadd.f32 %v2593_v8, %v1055_v19 }
  0xaa   : > { %v2606_v23 = vpop.f32.mrf.mxu0 }
  0xab   : > { %1143 = vmatmul.bf16.gmra.mxu1 %v1719_v17  ;;  %1232 = vmatmul.bf16.gmra.mxu2 %v1723_v18 }
  0xac   : > { %1321 = vmatmul.bf16.gmra.mxu3 %v1727_v20  ;;  %v2153_v20 = vld [vmem:[%s2427_s5 + $0x11c] sm:$0xf] }
  0xad   : > { %2104 = vmatmul.msk.bf16.gmra.mxu0 %vm973_vm1, %v1731_v21  ;;  %v1776_v21 = vld [vmem:[%s2427_s5 + $0x12c] sm:$0xf0] }
  0xae   : > { %v1075_v24 = vpop.f32.mrf.mxu2  ;;  %v1779_v37 = vor.u32 %v2153_v20, %v1776_v21 }
  0xaf   : > { %v2610_v25 = vadd.f32 %v2593_v8, %v1075_v24  ;;  %v1095_v26 = vpop.f32.mrf.mxu3  ;;  %v1782_v24 = vld [vmem:[%s2427_s5 + $0x120] sm:$0xf] }
  0xb0   : > { %v2613_v27 = vadd.f32 %v2593_v8, %v1095_v26  ;;  %v1057_v28 = vpop.f32.mrf.mxu1  ;;  %v2156_v26 = vld [vmem:[%s2427_s5 + $0x130] sm:$0xf0] }
  0xb1   : > { %v2616_v29 = vadd.f32 %v2593_v8, %v1057_v28  ;;  %v2154_v28 = vld [vmem:[%s2427_s5 + $0x124] sm:$0xf]  ;;  %v1783_v38 = vor.u32 %v2156_v26, %v1782_v24  ;;  %v1036_v26 = vadd.f32 %v2593_v8, %v2606_v23  ;;  %v1824_v23 = vld [vmem:[%s2427_s5 + $0x184] sm:$0xf0] }
  0xb2   : > { %v2618_v30 = vpop.f32.mrf.mxu0 }
  0xb6   : > { %v1077_v39 = vpop.f32.mrf.mxu2 }
  0xb7   : > { %v2629_v40 = vadd.f32 %v2593_v8, %v1077_v39  ;;  %v1097_v41 = vpop.f32.mrf.mxu3 }
  0xb8   : > { %v2632_v44 = vadd.f32 %v2593_v8, %v1097_v41  ;;  %v1060_v45 = vpop.f32.mrf.mxu1 }
  0xb9   : > { %v2635_v48 = vadd.f32 %v2593_v8, %v1060_v45 }
  0xba   : > { %v2637_v49 = vpop.f32.mrf.mxu0 }
  0xbb   : > { %1148 = vmatmul.bf16.gmra.mxu1 %v1739_v42  ;;  %1237 = vmatmul.bf16.gmra.mxu2 %v1743_v43  ;;  %v1787_v42 = vor.u32 %v2154_v28, %v1784_v31  ;;  %v1791_v43 = vor.u32 %v2157_v33, %v1790_v32 }
  0xbc   : > { %1326 = vmatmul.bf16.gmra.mxu3 %v1747_v46 }
  0xbd   : > { %2105 = vmatmul.msk.bf16.gmra.mxu0 %vm973_vm1, %v1751_v47 }
  0xbe   : > { %v1080_v50 = vpop.f32.mrf.mxu2 }
  0xbf   : > { %v2641_v51 = vadd.f32 %v2593_v8, %v1080_v50  ;;  %v1100_v52 = vpop.f32.mrf.mxu3 }
  0xc0   : > { %v2644_v53 = vadd.f32 %v2593_v8, %v1100_v52  ;;  %v1062_v54 = vpop.f32.mrf.mxu1 }
  0xc1   : > { %v2647_v55 = vadd.f32 %v2593_v8, %v1062_v54 }
  0xc2   : > { %v2649_v56 = vpop.f32.mrf.mxu0 }
  0xc6   : > { %v1082_v1 = vpop.f32.mrf.mxu2 }
  0xc7   : > { %v2660_v2 = vadd.f32 %v2593_v8, %v1082_v1  ;;  %v1102_v3 = vpop.f32.mrf.mxu3  ;;  %v1804_v1 = vld [vmem:[%s2427_s5 + $0x15c] sm:$0xf0] }
  0xc8   : > { %v2663_v6 = vadd.f32 %v2593_v8, %v1102_v3  ;;  %v1065_v7 = vpop.f32.mrf.mxu1  ;;  %v1810_v3 = vld [vmem:[%s2427_s5 + $0x150] sm:$0xf]  ;;  %v1807_v20 = vor.u32 %v2159_v0, %v1804_v1 }
  0xc9   : > { %v2666_v11 = vadd.f32 %v2593_v8, %v1065_v7 }
  0xca   : > { %v2668_v12 = vpop.f32.mrf.mxu0 }
  0xcb   : > { %1153 = vmatmul.bf16.gmra.mxu1 %v1759_v4  ;;  %1242 = vmatmul.bf16.gmra.mxu2 %v1763_v5  ;;  %v2162_v4 = vld [vmem:[%s2427_s5 + $0x160] sm:$0xf0] }
  0xcc   : > { %1331 = vmatmul.bf16.gmra.mxu3 %v1767_v9  ;;  %v1811_v21 = vor.u32 %v2162_v4, %v1810_v3 }
  0xcd   : > { %2106 = vmatmul.msk.bf16.gmra.mxu0 %vm973_vm1, %v1771_v10  ;;  %v1799_v10 = vor.u32 %v2158_v60, %v1796_v61  ;;  %v1830_v60 = vld [vmem:[%s2427_s5 + $0x178] sm:$0xf]  ;;  %v2167_v61 = vld [vmem:[%s2427_s5 + $0x188] sm:$0xf0] }
  0xce   : > { %v1085_v13 = vpop.f32.mrf.mxu2 }
  0xcf   : > { %v2672_v14 = vadd.f32 %v2593_v8, %v1085_v13  ;;  %v1105_v15 = vpop.f32.mrf.mxu3  ;;  %v1803_v13 = vor.u32 %v2161_v63, %v1802_v62 }
  0xd0   : > { %v2675_v16 = vadd.f32 %v2593_v8, %v1105_v15  ;;  %v1067_v17 = vpop.f32.mrf.mxu1 }
  0xd1   : > { %v2678_v18 = vadd.f32 %v2593_v8, %v1067_v17 }
  0xd2   : > { %v2680_v19 = vpop.f32.mrf.mxu0 }
  0xd6   : > { %v1087_v34 = vpop.f32.mrf.mxu2 }
  0xd7   : > { %v2691_v35 = vadd.f32 %v2593_v8, %v1087_v34  ;;  %v1107_v36 = vpop.f32.mrf.mxu3 }
  0xd8   : > { %v2694_v39 = vadd.f32 %v2593_v8, %v1107_v36  ;;  %v1070_v41 = vpop.f32.mrf.mxu1 }
  0xd9   : > { %v2697_v45 = vadd.f32 %v2593_v8, %v1070_v41  ;;  %v1816_v41 = vld [vmem:[%s2427_s5 + $0x17c] sm:$0xf0] }
  0xda   : > { %v2699_v46 = vpop.f32.mrf.mxu0 }
  0xdb   : > { %1158 = vmatmul.bf16.gmra.mxu1 %v1779_v37  ;;  %1247 = vmatmul.bf16.gmra.mxu2 %v1783_v38  ;;  %v1038_v37 = vadd.f32 %v2593_v8, %v2618_v30  ;;  %v2163_v38 = vld [vmem:[%s2427_s5 + $0x16c] sm:$0xf] }
  0xdc   : > { %1336 = vmatmul.bf16.gmra.mxu3 %v1787_v42  ;;  %v1822_v42 = vld [vmem:[%s2427_s5 + $0x170] sm:$0xf]  ;;  %v1819_v1 = vor.u32 %v2163_v38, %v1816_v41  ;;  %v1836_v38 = vld [vmem:[%s2427_s5 + $0x1a4] sm:$0xf0]  ;;  %v1842_v41 = vld [vmem:[%s2427_s5 + $0x198] sm:$0xf] }
  0xdd   : > { %2107 = vmatmul.msk.bf16.gmra.mxu0 %vm973_vm1, %v1791_v43  ;;  %v2166_v43 = vld [vmem:[%s2427_s5 + $0x180] sm:$0xf0] }
  0xde   : > { %v1090_v47 = vpop.f32.mrf.mxu2  ;;  %v1823_v3 = vor.u32 %v2166_v43, %v1822_v42  ;;  %v2171_v42 = vld [vmem:[%s2427_s5 + $0x1a8] sm:$0xf0]  ;;  %v2169_v43 = vld [vmem:[%s2427_s5 + $0x19c] sm:$0xf] }
  0xdf   : > { %v2703_v50 = vadd.f32 %v2593_v8, %v1090_v47  ;;  %v1110_v52 = vpop.f32.mrf.mxu3  ;;  %v2164_v47 = vld [vmem:[%s2427_s5 + $0x174] sm:$0xf] }
  0xe0   : > { %v2706_v54 = vadd.f32 %v2593_v8, %v1110_v52  ;;  %v1072_v57 = vpop.f32.mrf.mxu1 }
  0xe1   : > { %v2709_v58 = vadd.f32 %v2593_v8, %v1072_v57 }
  0xe2   : > { %v2711_v59 = vpop.f32.mrf.mxu0 }
  0xe6   : > { %v1092_v5 = vpop.f32.mrf.mxu2 }
  0xe7   : > { %v2722_v7 = vadd.f32 %v2593_v8, %v1092_v5  ;;  %v1112_v9 = vpop.f32.mrf.mxu3  ;;  %v1827_v5 = vor.u32 %v2164_v47, %v1824_v23  ;;  %v1850_v23 = vld [vmem:[%s2427_s5 + $0x1a0] sm:$0xf] }
  0xe8   : > { %v2725_v15 = vadd.f32 %v2593_v8, %v1112_v9  ;;  %v1124_v17 = vpop.f32.mrf.mxu1  ;;  %v1831_v9 = vor.u32 %v2167_v61, %v1830_v60  ;;  %v2172_v60 = vld [vmem:[%s2427_s5 + $0x1b0] sm:$0xf0] }
  0xe9   : > { %v1125_v31 = vadd.f32 %v1124_v17, %v1036_v26 }
  0xea   : > { %v1391_v24 = vpop.f32.mrf.mxu0 }
  0xeb   : > { %1163 = vmatmul.bf16.gmra.mxu1 %v1799_v10  ;;  %1252 = vmatmul.bf16.gmra.mxu2 %v1803_v13 }
  0xec   : > { %1341 = vmatmul.bf16.gmra.mxu3 %v1807_v20  ;;  %v1041_v20 = vadd.f32 %v2593_v8, %v2637_v49 }
  0xed   : > { %2108 = vmatmul.msk.bf16.gmra.mxu0 %vm973_vm1, %v1811_v21 }
  0xee   : > { %v1213_v28 = vpop.f32.mrf.mxu2 }
  0xef   : > { %v1302_v32 = vpop.f32.mrf.mxu3  ;;  %v1214_v34 = vadd.f32 %v1213_v28, %v1125_v31 }
  0xf0   : > { %v1126_v33 = vpop.f32.mrf.mxu1 }
  0xf1   : > { %v1303_v52 = vadd.f32 %v1302_v32, %v1214_v34  ;;  %v1127_v57 = vadd.f32 %v1126_v33, %v1038_v37  ;;  %v2168_v37 = vld [vmem:[%s2427_s5 + $0x194] sm:$0xf] }
  0xf2   : > { %v1393_v36 = vpop.f32.mrf.mxu0 }
  0xf3   : > { %v1392_v30 = vadd.f32 %v1391_v24, %v1303_v52 }
  0xf5   : > { %v1471_v21 = vmax.f32 %v1392_v30, 0.0 }
  0xf6   : > { %v1215_v62 = vpop.f32.mrf.mxu2 }
  0xf7   : > { %v1216_v63 = vadd.f32 %v1215_v62, %v1127_v57  ;;  %v1304_v0 = vpop.f32.mrf.mxu3  ;;  %v1844_v57 = vld [vmem:[%s2427_s5 + $0x1ac] sm:$0xf0] }
  0xf8   : > { %v1129_v4 = vpop.f32.mrf.mxu1 }
  0xf9   : > { %v1305_v10 = vadd.f32 %v1304_v0, %v1216_v63  ;;  %v1130_v31 = vadd.f32 %v1129_v4, %v1041_v20  ;;  %v1839_v0 = vor.u32 %v2168_v37, %v1836_v38  ;;  %v1847_v4 = vor.u32 %v2169_v43, %v1844_v57  ;;  %v2176_v37 = vld [vmem:[%s2427_s5 + $0x1d0] sm:$0xf0]  ;;  %v2174_v38 = vld [vmem:[%s2427_s5 + $0x1c4] sm:$0xf]  ;;  %v1864_v43 = vld [vmem:[%s2427_s5 + $0x1d4] sm:$0xf0] }
  0xfa   : > { %v1396_v13 = vpop.f32.mrf.mxu0 }
  0xfb   : > { %v1394_v17 = vadd.f32 %v1393_v36, %v1305_v10  ;;  %1168 = vmatmul.bf16.gmra.mxu1 %v1819_v1  ;;  %1257 = vmatmul.bf16.gmra.mxu2 %v1823_v3  ;;  %v1043_v36 = vadd.f32 %v2593_v8, %v2649_v56  ;;  %v1843_v1 = vor.u32 %v2171_v42, %v1842_v41 }
  0xfc   : > { %1346 = vmatmul.bf16.gmra.mxu3 %v1827_v5  ;;  %v1851_v5 = vor.u32 %v2172_v60, %v1850_v23 }
  0xfd   : > { %2109 = vmatmul.msk.bf16.gmra.mxu0 %vm973_vm1, %v1831_v9  ;;  %v1472_v26 = vmax.f32 %v1394_v17, 0.0  ;;  %v1046_v17 = vadd.f32 %v2593_v8, %v2668_v12  ;;  %v1862_v12 = vld [vmem:[%s2427_s5 + $0x1c0] sm:$0xf] }
  0xfe   : > { %v1218_v24 = vpop.f32.mrf.mxu2 }
  0xff   : > { %v2238_v28 = vpack.c.bf16 %v1472_v26, %v1471_v21  ;;  %v1307_v32 = vpop.f32.mrf.mxu3  ;;  %v1219_v49 = vadd.f32 %v1218_v24, %v1130_v31 }
 0x100   : > { %v1131_v33 = vpop.f32.mrf.mxu1 }
 0x101   : > { %2239 = vst [vmem:[%s2747_s20] sm:$0xff] %v2238_v28   ;;  %v1308_v47 = vadd.f32 %v1307_v32, %v1219_v49  ;;  %v1132_v52 = vadd.f32 %v1131_v33, %v1043_v36  ;;  %v1048_v49 = vadd.f32 %v2593_v8, %v2680_v19  ;;  %v1856_v36 = vld [vmem:[%s2427_s5 + $0x1cc] sm:$0xf0] }
 0x102   : > { %v1398_v34 = vpop.f32.mrf.mxu0 }
 0x103   : > { %v1397_v9 = vadd.f32 %v1396_v13, %v1308_v47  ;;  %v1870_v47 = vld [vmem:[%s2427_s5 + $0x1c8] sm:$0xf] }
 0x105   : > { %v1473_v20 = vmax.f32 %v1397_v9, 0.0  ;;  %v1051_v9 = vadd.f32 %v2593_v8, %v2699_v46  ;;  %v1882_v46 = vld [vmem:[%s2427_s5 + $0x1e8] sm:$0xf] }
 0x106   : > { %v1220_v61 = vpop.f32.mrf.mxu2 }
 0x107   : > { %v1221_v62 = vadd.f32 %v1220_v61, %v1132_v52  ;;  %v1309_v63 = vpop.f32.mrf.mxu3  ;;  %v2177_v52 = vld [vmem:[%s2427_s5 + $0x1d8] sm:$0xf0] }
 0x108   : > { %v1134_v3 = vpop.f32.mrf.mxu1 }
 0x109   : > { %v1310_v56 = vadd.f32 %v1309_v63, %v1221_v62  ;;  %v1135_v24 = vadd.f32 %v1134_v3, %v1046_v17  ;;  %v1863_v62 = vor.u32 %v2176_v37, %v1862_v12  ;;  %v1884_v12 = vld [vmem:[%s2427_s5 + $0x1fc] sm:$0xf0]  ;;  %v1890_v37 = vld [vmem:[%s2427_s5 + $0x1f0] sm:$0xf] }
 0x10a   : > { %v1401_v30 = vpop.f32.mrf.mxu0 }
 0x10b   : > { %v1399_v10 = vadd.f32 %v1398_v34, %v1310_v56  ;;  %1173 = vmatmul.bf16.gmra.mxu1 %v1839_v0  ;;  %1262 = vmatmul.bf16.gmra.mxu2 %v1843_v1  ;;  %v2173_v34 = vld [vmem:[%s2427_s5 + $0x1bc] sm:$0xf]  ;;  %v1867_v0 = vor.u32 %v2174_v38, %v1864_v43  ;;  %v1871_v1 = vor.u32 %v2177_v52, %v1870_v47  ;;  %v2182_v38 = vld [vmem:[%s2427_s5 + $0x200] sm:$0xf0] }
 0x10c   : > { %1351 = vmatmul.bf16.gmra.mxu3 %v1847_v4  ;;  %v1859_v61 = vor.u32 %v2173_v34, %v1856_v36 }
 0x10d   : > { %2110 = vmatmul.msk.bf16.gmra.mxu0 %vm973_vm1, %v1851_v5  ;;  %v1474_v21 = vmax.f32 %v1399_v10, 0.0 }
 0x10e   : > { %v1223_v13 = vpop.f32.mrf.mxu2 }
 0x10f   : > { %v2243_v26 = vpack.c.bf16 %v1474_v21, %v1473_v20  ;;  %v1312_v28 = vpop.f32.mrf.mxu3  ;;  %v1224_v32 = vadd.f32 %v1223_v13, %v1135_v24 }
 0x110   : > { %v1136_v31 = vpop.f32.mrf.mxu1 }
 0x111   : > { %2315 = vst [vmem:[%s2747_s20 + $0x8] sm:$0xff] %v2243_v26   ;;  %v1313_v41 = vadd.f32 %v1312_v28, %v1224_v32  ;;  %v1137_v42 = vadd.f32 %v1136_v31, %v1048_v49  ;;  %v1053_v28 = vadd.f32 %v2593_v8, %v2711_v59  ;;  %v2178_v31 = vld [vmem:[%s2427_s5 + $0x1e4] sm:$0xf]  ;;  %v1876_v32 = vld [vmem:[%s2427_s5 + $0x1f4] sm:$0xf0] }
 0x112   : > { %v1403_v33 = vpop.f32.mrf.mxu0  ;;  %v2179_v49 = vld [vmem:[%s2427_s5 + $0x1ec] sm:$0xf]  ;;  %v1879_v47 = vor.u32 %v2178_v31, %v1876_v32 }
 0x113   : > { %v1402_v3 = vadd.f32 %v1401_v30, %v1313_v41  ;;  %v2187_v31 = vld [vmem:[%s2427_s5 + $0x228] sm:$0xf0] }
 0x115   : > { %v1475_v56 = vmax.f32 %v1402_v3, 0.0 }
 0x116   : > { %v1225_v57 = vpop.f32.mrf.mxu2 }
 0x117   : > { %v1226_v23 = vadd.f32 %v1225_v57, %v1137_v42  ;;  %v1314_v60 = vpop.f32.mrf.mxu3 }
 0x118   : > { %v1139_v63 = vpop.f32.mrf.mxu1 }
 0x119   : > { %v1315_v19 = vadd.f32 %v1314_v60, %v1226_v23  ;;  %v1140_v20 = vadd.f32 %v1139_v63, %v1051_v9  ;;  %v1887_v23 = vor.u32 %v2179_v49, %v1884_v12  ;;  %v1891_v60 = vor.u32 %v2182_v38, %v1890_v37 }
 0x11a   : > { %v1406_v4 = vpop.f32.mrf.mxu0 }
 0x11b   : > { %v1404_v5 = vadd.f32 %v1403_v33, %v1315_v19  ;;  %1178 = vmatmul.bf16.gmra.mxu1 %v1859_v61  ;;  %1267 = vmatmul.bf16.gmra.mxu2 %v1863_v62  ;;  %v2181_v33 = vld [vmem:[%s2427_s5 + $0x1f8] sm:$0xf0] }
 0x11c   : > { %1356 = vmatmul.bf16.gmra.mxu3 %v1867_v0  ;;  %v1883_v52 = vor.u32 %v2181_v33, %v1882_v46 }
 0x11d   : > { %2111 = vmatmul.msk.bf16.gmra.mxu0 %vm973_vm1, %v1871_v1  ;;  %v1476_v10 = vmax.f32 %v1404_v5, 0.0 }
 0x11e   : > { %v1228_v30 = vpop.f32.mrf.mxu2 }
 0x11f   : > { %v2248_v17 = vpack.c.bf16 %v1476_v10, %v1475_v56  ;;  %v1317_v21 = vpop.f32.mrf.mxu3  ;;  %v1229_v26 = vadd.f32 %v1228_v30, %v1140_v20  ;;  %v2183_v10 = vld [vmem:[%s2427_s5 + $0x20c] sm:$0xf]  ;;  %v1896_v30 = vld [vmem:[%s2427_s5 + $0x21c] sm:$0xf0]  ;;  %v2186_v20 = vld [vmem:[%s2427_s5 + $0x220] sm:$0xf0] }
 0x120   : > { %v1141_v13 = vpop.f32.mrf.mxu1 }
 0x121   : > { %2316 = vst [vmem:[%s2747_s20 + $0x10] sm:$0xff] %v2248_v17   ;;  %v1318_v34 = vadd.f32 %v1317_v21, %v1229_v26  ;;  %v1142_v36 = vadd.f32 %v1141_v13, %v1053_v28  ;;  %v1902_v17 = vld [vmem:[%s2427_s5 + $0x210] sm:$0xf]  ;;  %v2184_v21 = vld [vmem:[%s2427_s5 + $0x214] sm:$0xf] }
 0x122   : > { %v1408_v24 = vpop.f32.mrf.mxu0  ;;  %v1910_v28 = vld [vmem:[%s2427_s5 + $0x218] sm:$0xf]  ;;  %v1903_v49 = vor.u32 %v2186_v20, %v1902_v17 }
 0x123   : > { %v1407_v8 = vadd.f32 %v1406_v4, %v1318_v34  ;;  %v1911_v12 = vor.u32 %v2187_v31, %v1910_v28 }
 0x125   : > { %v1477_v63 = vmax.f32 %v1407_v8, 0.0 }
 0x126   : > { %v1230_v41 = vpop.f32.mrf.mxu2 }
 0x127   : > { %v1231_v42 = vadd.f32 %v1230_v41, %v1142_v36  ;;  %v1319_v43 = vpop.f32.mrf.mxu3 }
 0x128   : > { %v1144_v57 = vpop.f32.mrf.mxu1 }
 0x129   : > { %v1320_v59 = vadd.f32 %v1319_v43, %v1231_v42  ;;  %v1145_v19 = vadd.f32 %v1144_v57, %v2604_v22  ;;  %v1899_v22 = vor.u32 %v2183_v10, %v1896_v30 }
 0x12a   : > { %v1411_v61 = vpop.f32.mrf.mxu0 }
 0x12b   : > { %v1409_v62 = vadd.f32 %v1408_v24, %v1320_v59  ;;  %1183 = vmatmul.bf16.gmra.mxu1 %v1879_v47  ;;  %1272 = vmatmul.bf16.gmra.mxu2 %v1883_v52  ;;  %v1904_v24 = vld [vmem:[%s2427_s5 + $0x224] sm:$0xf0] }
 0x12c   : > { %1361 = vmatmul.bf16.gmra.mxu3 %v1887_v23  ;;  %v1907_v36 = vor.u32 %v2184_v21, %v1904_v24 }
 0x12d   : > { %2112 = vmatmul.msk.bf16.gmra.mxu0 %vm973_vm1, %v1891_v60  ;;  %v1478_v0 = vmax.f32 %v1409_v62, 0.0  ;;  %v1916_v62 = vld [vmem:[%s2427_s5 + $0x244] sm:$0xf0] }
 0x12e   : > { %v1233_v1 = vpop.f32.mrf.mxu2 }
 0x12f   : > { %v2253_v3 = vpack.c.bf16 %v1478_v0, %v1477_v63  ;;  %v1322_v4 = vpop.f32.mrf.mxu3  ;;  %v1234_v9 = vadd.f32 %v1233_v1, %v1145_v19  ;;  %v1922_v63 = vld [vmem:[%s2427_s5 + $0x238] sm:$0xf]  ;;  %v2191_v0 = vld [vmem:[%s2427_s5 + $0x248] sm:$0xf0]  ;;  %v2189_v1 = vld [vmem:[%s2427_s5 + $0x23c] sm:$0xf] }
 0x130   : > { %v1146_v5 = vpop.f32.mrf.mxu1  ;;  %v1923_v17 = vor.u32 %v2191_v0, %v1922_v63 }
 0x131   : > { %2317 = vst [vmem:[%s2747_s20 + $0x18] sm:$0xff] %v2253_v3   ;;  %v1323_v13 = vadd.f32 %v1322_v4, %v1234_v9  ;;  %v1147_v26 = vadd.f32 %v1146_v5, %v2616_v29  ;;  %v1924_v4 = vld [vmem:[%s2427_s5 + $0x24c] sm:$0xf0]  ;;  %v1930_v5 = vld [vmem:[%s2427_s5 + $0x240] sm:$0xf] }
 0x132   : > { %v1413_v56 = vpop.f32.mrf.mxu0  ;;  %v2192_v9 = vld [vmem:[%s2427_s5 + $0x250] sm:$0xf0]  ;;  %v1927_v21 = vor.u32 %v2189_v1, %v1924_v4 }
 0x133   : > { %v1412_v37 = vadd.f32 %v1411_v61, %v1323_v13  ;;  %v2188_v61 = vld [vmem:[%s2427_s5 + $0x234] sm:$0xf]  ;;  %v1931_v13 = vor.u32 %v2192_v9, %v1930_v5 }
 0x135   : > { %v1479_v29 = vmax.f32 %v1412_v37, 0.0  ;;  %v2193_v37 = vld [vmem:[%s2427_s5 + $0x25c] sm:$0xf] }
 0x136   : > { %v1235_v32 = vpop.f32.mrf.mxu2 }
 0x137   : > { %v1236_v46 = vadd.f32 %v1235_v32, %v1147_v26  ;;  %v1324_v33 = vpop.f32.mrf.mxu3 }
 0x138   : > { %v1149_v34 = vpop.f32.mrf.mxu1 }
 0x139   : > { %v1325_v38 = vadd.f32 %v1324_v33, %v1236_v46  ;;  %v1150_v57 = vadd.f32 %v1149_v34, %v2635_v48  ;;  %v1919_v48 = vor.u32 %v2188_v61, %v1916_v62 }
 0x13a   : > { %v1416_v41 = vpop.f32.mrf.mxu0 }
 0x13b   : > { %v1414_v42 = vadd.f32 %v1413_v56, %v1325_v38  ;;  %1188 = vmatmul.bf16.gmra.mxu1 %v1899_v22  ;;  %1277 = vmatmul.bf16.gmra.mxu2 %v1903_v49  ;;  %v1936_v38 = vld [vmem:[%s2427_s5 + $0x26c] sm:$0xf0] }
 0x13c   : > { %1366 = vmatmul.bf16.gmra.mxu3 %v1907_v36 }
 0x13d   : > { %2113 = vmatmul.msk.bf16.gmra.mxu0 %vm973_vm1, %v1911_v12  ;;  %v1480_v43 = vmax.f32 %v1414_v42, 0.0  ;;  %v2196_v42 = vld [vmem:[%s2427_s5 + $0x270] sm:$0xf0] }
 0x13e   : > { %v1238_v47 = vpop.f32.mrf.mxu2 }
 0x13f   : > { %v2258_v52 = vpack.c.bf16 %v1480_v43, %v1479_v29  ;;  %v1327_v23 = vpop.f32.mrf.mxu3  ;;  %v1239_v8 = vadd.f32 %v1238_v47, %v1150_v57  ;;  %v2194_v29 = vld [vmem:[%s2427_s5 + $0x264] sm:$0xf]  ;;  %v1950_v57 = vld [vmem:[%s2427_s5 + $0x268] sm:$0xf] }
 0x140   : > { %v1151_v60 = vpop.f32.mrf.mxu1 }
 0x141   : > { %2318 = vst [vmem:[%s2747_s20 + $0x20] sm:$0xff] %v2258_v52   ;;  %v1328_v3 = vadd.f32 %v1327_v23, %v1239_v8  ;;  %v1152_v19 = vadd.f32 %v1151_v60, %v2647_v55  ;;  %v1944_v52 = vld [vmem:[%s2427_s5 + $0x274] sm:$0xf0]  ;;  %v2197_v23 = vld [vmem:[%s2427_s5 + $0x278] sm:$0xf0] }
 0x142   : > { %v1418_v59 = vpop.f32.mrf.mxu0  ;;  %v1947_v63 = vor.u32 %v2194_v29, %v1944_v52  ;;  %v1951_v0 = vor.u32 %v2197_v23, %v1950_v57 }
 0x143   : > { %v1417_v26 = vadd.f32 %v1416_v41, %v1328_v3  ;;  %v1942_v41 = vld [vmem:[%s2427_s5 + $0x260] sm:$0xf] }
 0x144   : > { %v1943_v61 = vor.u32 %v2196_v42, %v1942_v41 }
 0x145   : > { %v1481_v55 = vmax.f32 %v1417_v26, 0.0 }
 0x146   : > { %v1240_v56 = vpop.f32.mrf.mxu2 }
 0x147   : > { %v1241_v10 = vadd.f32 %v1240_v56, %v1152_v19  ;;  %v1329_v30 = vpop.f32.mrf.mxu3 }
 0x148   : > { %v1154_v20 = vpop.f32.mrf.mxu1 }
 0x149   : > { %v1330_v24 = vadd.f32 %v1329_v30, %v1241_v10  ;;  %v1155_v22 = vadd.f32 %v1154_v20, %v2666_v11  ;;  %v1939_v11 = vor.u32 %v2193_v37, %v1936_v38 }
 0x14a   : > { %v1421_v28 = vpop.f32.mrf.mxu0 }
 0x14b   : > { %v1419_v31 = vadd.f32 %v1418_v59, %v1330_v24  ;;  %1193 = vmatmul.bf16.gmra.mxu1 %v1919_v48  ;;  %1282 = vmatmul.bf16.gmra.mxu2 %v1923_v17 }
 0x14c   : > { %1371 = vmatmul.bf16.gmra.mxu3 %v1927_v21 }
 0x14d   : > { %2114 = vmatmul.msk.bf16.gmra.mxu0 %vm973_vm1, %v1931_v13  ;;  %v1482_v32 = vmax.f32 %v1419_v31, 0.0 }
 0x14e   : > { %v1243_v46 = vpop.f32.mrf.mxu2 }
 0x14f   : > { %v2263_v33 = vpack.c.bf16 %v1482_v32, %v1481_v55  ;;  %v1332_v49 = vpop.f32.mrf.mxu3  ;;  %v1244_v36 = vadd.f32 %v1243_v46, %v1155_v22 }
 0x150   : > { %v1156_v34 = vpop.f32.mrf.mxu1 }
 0x151   : > { %2319 = vst [vmem:[%s2747_s20 + $0x28] sm:$0xff] %v2263_v33   ;;  %v1333_v43 = vadd.f32 %v1332_v49, %v1244_v36  ;;  %v1157_v47 = vadd.f32 %v1156_v34, %v2678_v18 }
 0x152   : > { %v1423_v12 = vpop.f32.mrf.mxu0 }
 0x153   : > { %v1422_v1 = vadd.f32 %v1421_v28, %v1333_v43 }
 0x155   : > { %v1483_v18 = vmax.f32 %v1422_v1, 0.0 }
 0x156   : > { %v1245_v60 = vpop.f32.mrf.mxu2 }
 0x157   : > { %v1246_v8 = vadd.f32 %v1245_v60, %v1157_v47  ;;  %v1334_v59 = vpop.f32.mrf.mxu3 }
 0x158   : > { %v1159_v62 = vpop.f32.mrf.mxu1 }
 0x159   : > { %v1335_v3 = vadd.f32 %v1334_v59, %v1246_v8  ;;  %v1160_v10 = vadd.f32 %v1159_v62, %v2697_v45 }
 0x15a   : > { %v1426_v19 = vpop.f32.mrf.mxu0 }
 0x15b   : > { %v1424_v4 = vadd.f32 %v1423_v12, %v1335_v3  ;;  %1198 = vmatmul.bf16.gmra.mxu1 %v1939_v11  ;;  %1287 = vmatmul.bf16.gmra.mxu2 %v1943_v61 }
 0x15c   : > { %1376 = vmatmul.bf16.gmra.mxu3 %v1947_v63 }
 0x15d   : > { %2115 = vmatmul.msk.bf16.gmra.mxu0 %vm973_vm1, %v1951_v0  ;;  %v1484_v5 = vmax.f32 %v1424_v4, 0.0 }
 0x15e   : > { %v1248_v9 = vpop.f32.mrf.mxu2 }
 0x15f   : > { %v2268_v56 = vpack.c.bf16 %v1484_v5, %v1483_v18  ;;  %v1337_v30 = vpop.f32.mrf.mxu3  ;;  %v1249_v17 = vadd.f32 %v1248_v9, %v1160_v10 }
 0x160   : > { %v1161_v48 = vpop.f32.mrf.mxu1 }
 0x161   : > { %2320 = vst [vmem:[%s2747_s20 + $0x30] sm:$0xff] %v2268_v56   ;;  %v1338_v21 = vadd.f32 %v1337_v30, %v1249_v17  ;;  %v1162_v13 = vadd.f32 %v1161_v48, %v2709_v58 }
 0x162   : > { %v1428_v20 = vpop.f32.mrf.mxu0 }
 0x163   : > { %v1427_v55 = vadd.f32 %v1426_v19, %v1338_v21 }
 0x165   : > { %v1485_v22 = vmax.f32 %v1427_v55, 0.0 }
 0x166   : > { %v1250_v26 = vpop.f32.mrf.mxu2 }
 0x167   : > { %v1251_v24 = vadd.f32 %v1250_v26, %v1162_v13  ;;  %v1339_v28 = vpop.f32.mrf.mxu3 }
 0x168   : > { %v1164_v31 = vpop.f32.mrf.mxu1 }
 0x169   : > { %v1340_v32 = vadd.f32 %v1339_v28, %v1251_v24  ;;  %v1165_v36 = vadd.f32 %v1164_v31, %v2610_v25 }
 0x16a   : > { %v1431_v46 = vpop.f32.mrf.mxu0 }
 0x16b   : > { %v1429_v33 = vadd.f32 %v1428_v20, %v1340_v32 }
 0x16d   : > { %v1486_v49 = vmax.f32 %v1429_v33, 0.0 }
 0x16e   : > { %v1253_v45 = vpop.f32.mrf.mxu2 }
 0x16f   : > { %v2273_v34 = vpack.c.bf16 %v1486_v49, %v1485_v22  ;;  %v1342_v12 = vpop.f32.mrf.mxu3  ;;  %v1254_v38 = vadd.f32 %v1253_v45, %v1165_v36 }
 0x170   : > { %v1166_v37 = vpop.f32.mrf.mxu1 }
 0x171   : > { %2321 = vst [vmem:[%s2747_s20 + $0x38] sm:$0xff] %v2273_v34   ;;  %v1343_v41 = vadd.f32 %v1342_v12, %v1254_v38  ;;  %v1167_v42 = vadd.f32 %v1166_v37, %v2629_v40 }
 0x172   : > { %v1433_v58 = vpop.f32.mrf.mxu0 }
 0x173   : > { %v1432_v57 = vadd.f32 %v1431_v46, %v1343_v41 }
 0x175   : > { %v1487_v59 = vmax.f32 %v1432_v57, 0.0 }
 0x176   : > { %v1255_v29 = vpop.f32.mrf.mxu2 }
 0x177   : > { %v1256_v43 = vadd.f32 %v1255_v29, %v1167_v42  ;;  %v1344_v47 = vpop.f32.mrf.mxu3 }
 0x178   : > { %v1169_v52 = vpop.f32.mrf.mxu1 }
 0x179   : > { %v1345_v23 = vadd.f32 %v1344_v47, %v1256_v43  ;;  %v1170_v62 = vadd.f32 %v1169_v52, %v2641_v51 }
 0x17a   : > { %v1436_v60 = vpop.f32.mrf.mxu0 }
 0x17b   : > { %v1434_v8 = vadd.f32 %v1433_v58, %v1345_v23 }
 0x17d   : > { %v1488_v11 = vmax.f32 %v1434_v8, 0.0 }
 0x17e   : > { %v1258_v25 = vpop.f32.mrf.mxu2 }
 0x17f   : > { %v2278_v61 = vpack.c.bf16 %v1488_v11, %v1487_v59  ;;  %v1347_v63 = vpop.f32.mrf.mxu3  ;;  %v1259_v1 = vadd.f32 %v1258_v25, %v1170_v62 }
 0x180   : > { %v1171_v0 = vpop.f32.mrf.mxu1 }
 0x181   : > { %2322 = vst [vmem:[%s2747_s20 + $0x40] sm:$0xff] %v2278_v61   ;;  %v1348_v3 = vadd.f32 %v1347_v63, %v1259_v1  ;;  %v1172_v19 = vadd.f32 %v1171_v0, %v2660_v2 }
 0x182   : > { %v1438_v40 = vpop.f32.mrf.mxu0 }
 0x183   : > { %v1437_v56 = vadd.f32 %v1436_v60, %v1348_v3 }
 0x185   : > { %v1489_v17 = vmax.f32 %v1437_v56, 0.0 }
 0x186   : > { %v1260_v4 = vpop.f32.mrf.mxu2 }
 0x187   : > { %v1261_v18 = vadd.f32 %v1260_v4, %v1172_v19  ;;  %v1349_v5 = vpop.f32.mrf.mxu3 }
 0x188   : > { %v1174_v9 = vpop.f32.mrf.mxu1 }
 0x189   : > { %v1350_v10 = vadd.f32 %v1349_v5, %v1261_v18  ;;  %v1175_v13 = vadd.f32 %v1174_v9, %v2672_v14 }
 0x18a   : > { %v1441_v30 = vpop.f32.mrf.mxu0 }
 0x18b   : > { %v1439_v48 = vadd.f32 %v1438_v40, %v1350_v10 }
 0x18d   : > { %v1490_v20 = vmax.f32 %v1439_v48, 0.0 }
 0x18e   : > { %v1263_v51 = vpop.f32.mrf.mxu2 }
 0x18f   : > { %v2283_v21 = vpack.c.bf16 %v1490_v20, %v1489_v17  ;;  %v1352_v26 = vpop.f32.mrf.mxu3  ;;  %v1264_v28 = vadd.f32 %v1263_v51, %v1175_v13 }
 0x190   : > { %v1176_v24 = vpop.f32.mrf.mxu1 }
 0x191   : > { %2323 = vst [vmem:[%s2747_s20 + $0x48] sm:$0xff] %v2283_v21   ;;  %v1353_v31 = vadd.f32 %v1352_v26, %v1264_v28  ;;  %v1177_v55 = vadd.f32 %v1176_v24, %v2691_v35 }
 0x192   : > { %v1443_v2 = vpop.f32.mrf.mxu0 }
 0x193   : > { %v1442_v49 = vadd.f32 %v1441_v30, %v1353_v31 }
 0x195   : > { %v1491_v12 = vmax.f32 %v1442_v49, 0.0 }
 0x196   : > { %v1265_v32 = vpop.f32.mrf.mxu2 }
 0x197   : > { %v1266_v46 = vadd.f32 %v1265_v32, %v1177_v55  ;;  %v1354_v33 = vpop.f32.mrf.mxu3 }
 0x198   : > { %v1179_v22 = vpop.f32.mrf.mxu1 }
 0x199   : > { %v1355_v45 = vadd.f32 %v1354_v33, %v1266_v46  ;;  %v1180_v58 = vadd.f32 %v1179_v22, %v2703_v50 }
 0x19a   : > { %v1446_v34 = vpop.f32.mrf.mxu0 }
 0x19b   : > { %v1444_v36 = vadd.f32 %v1443_v2, %v1355_v45 }
 0x19d   : > { %v1492_v37 = vmax.f32 %v1444_v36, 0.0 }
 0x19e   : > { %v1268_v14 = vpop.f32.mrf.mxu2 }
 0x19f   : > { %v2288_v38 = vpack.c.bf16 %v1492_v37, %v1491_v12  ;;  %v1357_v41 = vpop.f32.mrf.mxu3  ;;  %v1269_v29 = vadd.f32 %v1268_v14, %v1180_v58 }
 0x1a0   : > { %v1181_v42 = vpop.f32.mrf.mxu1 }
 0x1a1   : > { %2324 = vst [vmem:[%s2747_s20 + $0x50] sm:$0xff] %v2288_v38   ;;  %v1358_v43 = vadd.f32 %v1357_v41, %v1269_v29  ;;  %v1182_v47 = vadd.f32 %v1181_v42, %v2722_v7 }
 0x1a2   : > { %v1448_v35 = vpop.f32.mrf.mxu0 }
 0x1a3   : > { %v1447_v8 = vadd.f32 %v1446_v34, %v1358_v43 }
 0x1a5   : > { %v1493_v61 = vmax.f32 %v1447_v8, 0.0 }
 0x1a6   : > { %v1270_v52 = vpop.f32.mrf.mxu2 }
 0x1a7   : > { %v1271_v57 = vadd.f32 %v1270_v52, %v1182_v47  ;;  %v1359_v23 = vpop.f32.mrf.mxu3 }
 0x1a8   : > { %v1184_v60 = vpop.f32.mrf.mxu1 }
 0x1a9   : > { %v1360_v59 = vadd.f32 %v1359_v23, %v1271_v57  ;;  %v1185_v0 = vadd.f32 %v1184_v60, %v2613_v27 }
 0x1aa   : > { %v1451_v11 = vpop.f32.mrf.mxu0 }
 0x1ab   : > { %v1449_v25 = vadd.f32 %v1448_v35, %v1360_v59 }
 0x1ad   : > { %v1494_v62 = vmax.f32 %v1449_v25, 0.0 }
 0x1ae   : > { %v1273_v50 = vpop.f32.mrf.mxu2 }
 0x1af   : > { %v2293_v63 = vpack.c.bf16 %v1494_v62, %v1493_v61  ;;  %v1362_v1 = vpop.f32.mrf.mxu3  ;;  %v1274_v3 = vadd.f32 %v1273_v50, %v1185_v0 }
 0x1b0   : > { %v1186_v40 = vpop.f32.mrf.mxu1 }
 0x1b1   : > { %2325 = vst [vmem:[%s2747_s20 + $0x58] sm:$0xff] %v2293_v63   ;;  %v1363_v19 = vadd.f32 %v1362_v1, %v1274_v3  ;;  %v1187_v4 = vadd.f32 %v1186_v40, %v2632_v44 }
 0x1b2   : > { %v1453_v7 = vpop.f32.mrf.mxu0 }
 0x1b3   : > { %v1452_v10 = vadd.f32 %v1451_v11, %v1363_v19 }
 0x1b5   : > { %v1495_v20 = vmax.f32 %v1452_v10, 0.0 }
 0x1b6   : > { %v1275_v18 = vpop.f32.mrf.mxu2 }
 0x1b7   : > { %v1276_v5 = vadd.f32 %v1275_v18, %v1187_v4  ;;  %v1364_v9 = vpop.f32.mrf.mxu3 }
 0x1b8   : > { %v1189_v56 = vpop.f32.mrf.mxu1 }
 0x1b9   : > { %v1365_v30 = vadd.f32 %v1364_v9, %v1276_v5  ;;  %v1190_v13 = vadd.f32 %v1189_v56, %v2644_v53 }
 0x1ba   : > { %v1456_v48 = vpop.f32.mrf.mxu0 }
 0x1bb   : > { %v1454_v17 = vadd.f32 %v1453_v7, %v1365_v30 }
 0x1bd   : > { %v1496_v51 = vmax.f32 %v1454_v17, 0.0 }
 0x1be   : > { %v1278_v27 = vpop.f32.mrf.mxu2 }
 0x1bf   : > { %v2298_v21 = vpack.c.bf16 %v1496_v51, %v1495_v20  ;;  %v1367_v26 = vpop.f32.mrf.mxu3  ;;  %v1279_v28 = vadd.f32 %v1278_v27, %v1190_v13 }
 0x1c0   : > { %v1191_v24 = vpop.f32.mrf.mxu1 }
 0x1c1   : > { %2326 = vst [vmem:[%s2747_s20 + $0x60] sm:$0xff] %v2298_v21   ;;  %v1368_v2 = vadd.f32 %v1367_v26, %v1279_v28  ;;  %v1192_v31 = vadd.f32 %v1191_v24, %v2663_v6 }
 0x1c2   : > { %v1458_v44 = vpop.f32.mrf.mxu0 }
 0x1c3   : > { %v1457_v22 = vadd.f32 %v1456_v48, %v1368_v2 }
 0x1c5   : > { %v1497_v36 = vmax.f32 %v1457_v22, 0.0 }
 0x1c6   : > { %v1280_v55 = vpop.f32.mrf.mxu2 }
 0x1c7   : > { %v1281_v32 = vadd.f32 %v1280_v55, %v1192_v31  ;;  %v1369_v46 = vpop.f32.mrf.mxu3 }
 0x1c8   : > { %v1194_v33 = vpop.f32.mrf.mxu1 }
 0x1c9   : > { %v1370_v49 = vadd.f32 %v1369_v46, %v1281_v32  ;;  %v1195_v14 = vadd.f32 %v1194_v33, %v2675_v16 }
 0x1ca   : > { %v1461_v34 = vpop.f32.mrf.mxu0 }
 0x1cb   : > { %v1459_v45 = vadd.f32 %v1458_v44, %v1370_v49 }
 0x1cd   : > { %v1498_v12 = vmax.f32 %v1459_v45, 0.0 }
 0x1ce   : > { %v1283_v53 = vpop.f32.mrf.mxu2 }
 0x1cf   : > { %v2303_v37 = vpack.c.bf16 %v1498_v12, %v1497_v36  ;;  %v1372_v38 = vpop.f32.mrf.mxu3  ;;  %v1284_v41 = vadd.f32 %v1283_v53, %v1195_v14 }
 0x1d0   : > { %v1196_v58 = vpop.f32.mrf.mxu1 }
 0x1d1   : > { %2327 = vst [vmem:[%s2747_s20 + $0x68] sm:$0xff] %v2303_v37   ;;  %v1373_v6 = vadd.f32 %v1372_v38, %v1284_v41  ;;  %v1197_v42 = vadd.f32 %v1196_v58, %v2694_v39 }
 0x1d2   : > { %v1463_v29 = vpop.f32.mrf.mxu0 }
 0x1d3   : > { %v1462_v57 = vadd.f32 %v1461_v34, %v1373_v6 }
 0x1d5   : > { %v1499_v8 = vmax.f32 %v1462_v57, 0.0 }
 0x1d6   : > { %v1285_v35 = vpop.f32.mrf.mxu2 }
 0x1d7   : > { %v1286_v43 = vadd.f32 %v1285_v35, %v1197_v42  ;;  %v1374_v47 = vpop.f32.mrf.mxu3 }
 0x1d8   : > { %v1199_v52 = vpop.f32.mrf.mxu1 }
 0x1d9   : > { %v1375_v23 = vadd.f32 %v1374_v47, %v1286_v43  ;;  %v1200_v25 = vadd.f32 %v1199_v52, %v2706_v54 }
 0x1da   : > { %v1466_v62 = vpop.f32.mrf.mxu0 }
 0x1db   : > { %v1464_v60 = vadd.f32 %v1463_v29, %v1375_v23 }
 0x1dd   : > { %v1500_v59 = vmax.f32 %v1464_v60, 0.0 }
 0x1de   : > { %v1288_v11 = vpop.f32.mrf.mxu2 }
 0x1df   : > { %v2308_v16 = vpack.c.bf16 %v1500_v59, %v1499_v8  ;;  %v1377_v61 = vpop.f32.mrf.mxu3  ;;  %v1289_v39 = vadd.f32 %v1288_v11, %v1200_v25 }
 0x1e0   : > { %v1201_v50 = vpop.f32.mrf.mxu1 }
 0x1e1   : > { %2328 = vst [vmem:[%s2747_s20 + $0x70] sm:$0xff] %v2308_v16   ;;  %v1378_v63 = vadd.f32 %v1377_v61, %v1289_v39  ;;  %v1202_v0 = vadd.f32 %v1201_v50, %v2725_v15 }
 0x1e2   : > { %v1468_v4 = vpop.f32.mrf.mxu0 }
 0x1e3   : > { %v1467_v7 = vadd.f32 %v1466_v62, %v1378_v63 }
 0x1e5   : > { %v1501_v5 = vmax.f32 %v1467_v7, 0.0 }
 0x1e6   : > { %v1290_v1 = vpop.f32.mrf.mxu2 }
 0x1e7   : > { %v1291_v40 = vadd.f32 %v1290_v1, %v1202_v0  ;;  %v1379_v3 = vpop.f32.mrf.mxu3 }
 0x1e9   : > { %v1380_v19 = vadd.f32 %v1379_v3, %v1291_v40 }
 0x1eb   : > { %v1469_v18 = vadd.f32 %v1468_v4, %v1380_v19 }
 0x1ed   : > { %v1502_v9 = vmax.f32 %v1469_v18, 0.0 }
 0x1ef   : > { %v2313_v56 = vpack.c.bf16 %v1502_v9, %v1501_v5 }
 0x1f1   : > { %2329 = vst [vmem:[%s2747_s20 + $0x78] sm:$0xff] %v2313_v56  }
 0x1f2 PF: > { %s13_s12 = sadd.s32 1, %s2370_s12  }
 0x1f3   : > { %p10_p4 = scmp.ge.s32.totalorder %s13_s12, 6  }
 0x1f5   :  { %12 = sbr.rel (!%p10_p4) target bundleno = 1 (0x1), region = 62 }

// kernel: rgb_encoder_forward.5
= control target key start
LH: loop header
LB: loop body
LE: loop exit
PB: predicated region body
PF: predicated region fallthrough
CT: control target
= control target key end

     0   :  { %vm555_vm0 = vcmask 523264   ;;  %s1794_s1 = inlined_call_operand.vmem [shape: bf16[576,128], index: 1, kind: input, shape index: {}]   ;;  %s1795_s2 = inlined_call_operand.vmem [shape: f32[1,128], index: 2, kind: input, shape index: {}]   ;;  %s1796_s0 = inlined_call_operand.vmem [shape: bf16[128,576], index: 0, kind: input, shape index: {}]   ;;  %s1797_s3 = inlined_call_operand.vmem [shape: bf16[128,128], index: 3, kind: output, shape index: {}]  }
   0x1   :  { %v1236_v0 = vld [vmem:[%s1794_s1 + $0x38] sm:$0xff]  ;;  %v1235_v1 = vld [vmem:[%s1794_s1 + $0x30] sm:$0xff]  ;;  %v1234_v2 = vld [vmem:[%s1794_s1 + $0x28] sm:$0xff] }
   0x2   :  { %1312 = vmatpush.bf16.msra.mxu1 %v1236_v0  ;;  %1313 = vmatpush.bf16.msra.mxu2 %v1236_v0  ;;  %v1233_v3 = vld [vmem:[%s1794_s1 + $0x20] sm:$0xff]  ;;  %v1232_v4 = vld [vmem:[%s1794_s1 + $0x18] sm:$0xff]  ;;  %v1231_v5 = vld [vmem:[%s1794_s1 + $0x10] sm:$0xff] }
   0x3   :  { %1314 = vmatpush.bf16.msra.mxu3 %v1236_v0  ;;  %580 = vmatpush.bf16.msra.mxu0 %v1236_v0  ;;  %v1230_v6 = vld [vmem:[%s1794_s1 + $0x8] sm:$0xff]  ;;  %v1229_v7 = vld [vmem:[%s1794_s1] sm:$0xff]  ;;  %v919_v8 = vld [vmem:[%s1796_s0 + $0x50] sm:$0xf] }
   0x4   :  { %v1201_v9 = vld [vmem:[%s1796_s0 + $0x60] sm:$0xf0]  ;;  %v959_v10 = vld [vmem:[%s1796_s0 + $0xa0] sm:$0xf]  ;;  %v1211_v11 = vld [vmem:[%s1796_s0 + $0xb0] sm:$0xf0] }
   0x5   :  { %v999_v12 = vld [vmem:[%s1796_s0 + $0xf0] sm:$0xf]  ;;  %v1221_v13 = vld [vmem:[%s1796_s0 + $0x100] sm:$0xf0]  ;;  %v879_v14 = vld [vmem:[%s1796_s0] sm:$0xf]  ;;  %v920_v18 = vor.u32 %v1201_v9, %v919_v8  ;;  %v960_v19 = vor.u32 %v1211_v11, %v959_v10 }
   0x6   :  { %1315 = vmatpush.bf16.msra.mxu1 %v1235_v1  ;;  %1316 = vmatpush.bf16.msra.mxu2 %v1235_v1  ;;  %v1191_v15 = vld [vmem:[%s1796_s0 + $0x10] sm:$0xf0]  ;;  %v1252_v16 = vld [vmem:[%s1794_s1 + $0xb8] sm:$0xff]  ;;  %v1000_v20 = vor.u32 %v1221_v13, %v999_v12  ;;  %v1250_v28 = vld [vmem:[%s1794_s1 + $0xa8] sm:$0xff] }
   0x7   :  { %1317 = vmatpush.bf16.msra.mxu3 %v1235_v1  ;;  %581 = vmatpush.bf16.msra.mxu0 %v1235_v1  ;;  %v1244_v17 = vld [vmem:[%s1794_s1 + $0x78] sm:$0xff]  ;;  %v880_v21 = vor.u32 %v1191_v15, %v879_v14  ;;  %v1251_v24 = vld [vmem:[%s1794_s1 + $0xb0] sm:$0xff]  ;;  %v1242_v29 = vld [vmem:[%s1794_s1 + $0x68] sm:$0xff] }
   0x8   :  { %v1260_v22 = vld [vmem:[%s1794_s1 + $0xf8] sm:$0xff]  ;;  %v1243_v25 = vld [vmem:[%s1794_s1 + $0x70] sm:$0xff]  ;;  %v1258_v30 = vld [vmem:[%s1794_s1 + $0xe8] sm:$0xff] }
   0x9   :  { %v1264_v23 = vld [vmem:[%s1794_s1 + $0x118] sm:$0xff]  ;;  %v1259_v26 = vld [vmem:[%s1794_s1 + $0xf0] sm:$0xff]  ;;  %v1262_v31 = vld [vmem:[%s1794_s1 + $0x108] sm:$0xff] }
   0xa   :  { %1318 = vmatpush.bf16.msra.mxu1 %v1234_v2  ;;  %1319 = vmatpush.bf16.msra.mxu2 %v1234_v2  ;;  %v1263_v27 = vld [vmem:[%s1794_s1 + $0x110] sm:$0xff]  ;;  %v1249_v32 = vld [vmem:[%s1794_s1 + $0xa0] sm:$0xff]  ;;  %v939_v35 = vld [vmem:[%s1796_s0 + $0x78] sm:$0xf] }
   0xb   :  { %1320 = vmatpush.bf16.msra.mxu3 %v1234_v2  ;;  %582 = vmatpush.bf16.msra.mxu0 %v1234_v2  ;;  %v1241_v33 = vld [vmem:[%s1794_s1 + $0x60] sm:$0xff]  ;;  %v1206_v36 = vld [vmem:[%s1796_s0 + $0x88] sm:$0xf0]  ;;  %v979_v37 = vld [vmem:[%s1796_s0 + $0xc8] sm:$0xf] }
   0xc   :  { %v1257_v34 = vld [vmem:[%s1794_s1 + $0xe0] sm:$0xff]  ;;  %v1216_v38 = vld [vmem:[%s1796_s0 + $0xd8] sm:$0xf0]  ;;  %v1019_v39 = vld [vmem:[%s1796_s0 + $0x118] sm:$0xf]  ;;  %v940_v46 = vor.u32 %v1206_v36, %v939_v35 }
   0xd   :  { %v1226_v40 = vld [vmem:[%s1796_s0 + $0x128] sm:$0xf0]  ;;  %v899_v41 = vld [vmem:[%s1796_s0 + $0x28] sm:$0xf]  ;;  %v1196_v42 = vld [vmem:[%s1796_s0 + $0x38] sm:$0xf0]  ;;  %v980_v47 = vor.u32 %v1216_v38, %v979_v37 }
   0xe   :  { %1321 = vmatpush.bf16.msra.mxu1 %v1233_v3  ;;  %1322 = vmatpush.bf16.msra.mxu2 %v1233_v3  ;;  %v1261_v43 = vld [vmem:[%s1794_s1 + $0x100] sm:$0xff]  ;;  %v1248_v44 = vld [vmem:[%s1794_s1 + $0x98] sm:$0xff]  ;;  %v1020_v48 = vor.u32 %v1226_v40, %v1019_v39  ;;  %v900_v49 = vor.u32 %v1196_v42, %v899_v41  ;;  %v1247_v51 = vld [vmem:[%s1794_s1 + $0x90] sm:$0xff] }
   0xf   :  { %1323 = vmatpush.bf16.msra.mxu3 %v1233_v3  ;;  %583 = vmatpush.bf16.msra.mxu0 %v1233_v3  ;;  %v1240_v45 = vld [vmem:[%s1794_s1 + $0x58] sm:$0xff]  ;;  %v1239_v52 = vld [vmem:[%s1794_s1 + $0x50] sm:$0xff]  ;;  %v1246_v54 = vld [vmem:[%s1794_s1 + $0x88] sm:$0xff] }
  0x10   :  { %v1256_v50 = vld [vmem:[%s1794_s1 + $0xd8] sm:$0xff]  ;;  %v1255_v53 = vld [vmem:[%s1794_s1 + $0xd0] sm:$0xff]  ;;  %v1238_v55 = vld [vmem:[%s1794_s1 + $0x48] sm:$0xff] }
  0x11   :  { %v1254_v56 = vld [vmem:[%s1794_s1 + $0xc8] sm:$0xff]  ;;  %v1245_v57 = vld [vmem:[%s1794_s1 + $0x80] sm:$0xff]  ;;  %v881_v61 = vld [vmem:[%s1796_s0 + $0x14] sm:$0xf0] }
  0x12   :  { %1324 = vmatpush.bf16.msra.mxu1 %v1232_v4  ;;  %1325 = vmatpush.bf16.msra.mxu2 %v1232_v4  ;;  %v1237_v58 = vld [vmem:[%s1794_s1 + $0x40] sm:$0xff]  ;;  %v887_v62 = vld [vmem:[%s1796_s0 + $0x8] sm:$0xf]  ;;  %v1192_v63 = vld [vmem:[%s1796_s0 + $0x18] sm:$0xf0] }
  0x13   :  { %1326 = vmatpush.bf16.msra.mxu3 %v1232_v4  ;;  %584 = vmatpush.bf16.msra.mxu0 %v1232_v4  ;;  %v1253_v59 = vld [vmem:[%s1794_s1 + $0xc0] sm:$0xff]  ;;  %v1190_v0 = vld [vmem:[%s1796_s0 + $0xc] sm:$0xf]  ;;  %v895_v2 = vld [vmem:[%s1796_s0 + $0x10] sm:$0xf] }
  0x14   :  { %v1189_v60 = vld [vmem:[%s1796_s0 + $0x4] sm:$0xf]  ;;  %v889_v1 = vld [vmem:[%s1796_s0 + $0x1c] sm:$0xf0]  ;;  %v1194_v8 = vld [vmem:[%s1796_s0 + $0x2c] sm:$0xf] }
  0x15   :  { %v1193_v3 = vld [vmem:[%s1796_s0 + $0x20] sm:$0xf0]  ;;  %v884_v4 = vor.u32 %v1189_v60, %v881_v61  ;;  %v901_v9 = vld [vmem:[%s1796_s0 + $0x3c] sm:$0xf0]  ;;  %v907_v10 = vld [vmem:[%s1796_s0 + $0x30] sm:$0xf] }
  0x16   :  { %1327 = vmatpush.bf16.msra.mxu1 %v1231_v5  ;;  %1328 = vmatpush.bf16.msra.mxu2 %v1231_v5  ;;  %v1197_v11 = vld [vmem:[%s1796_s0 + $0x40] sm:$0xf0]  ;;  %v1195_v12 = vld [vmem:[%s1796_s0 + $0x34] sm:$0xf]  ;;  %v909_v13 = vld [vmem:[%s1796_s0 + $0x44] sm:$0xf0] }
  0x17   :  { %1329 = vmatpush.bf16.msra.mxu3 %v1231_v5  ;;  %585 = vmatpush.bf16.msra.mxu0 %v1231_v5  ;;  %v888_v5 = vor.u32 %v1192_v63, %v887_v62  ;;  %v915_v14 = vld [vmem:[%s1796_s0 + $0x38] sm:$0xf]  ;;  %v1198_v15 = vld [vmem:[%s1796_s0 + $0x48] sm:$0xf0]  ;;  %v1207_v35 = vld [vmem:[%s1796_s0 + $0x90] sm:$0xf0] }
  0x18   :  { %v1205_v36 = vld [vmem:[%s1796_s0 + $0x84] sm:$0xf]  ;;  %v949_v37 = vld [vmem:[%s1796_s0 + $0x94] sm:$0xf0]  ;;  %v955_v38 = vld [vmem:[%s1796_s0 + $0x88] sm:$0xf] }
  0x19   :  { %v1208_v39 = vld [vmem:[%s1796_s0 + $0x98] sm:$0xf0]  ;;  %v952_v42 = vor.u32 %v1205_v36, %v949_v37  ;;  %v1215_v60 = vld [vmem:[%s1796_s0 + $0xd4] sm:$0xf]  ;;  %v989_v61 = vld [vmem:[%s1796_s0 + $0xe4] sm:$0xf0] }
  0x1a   :  { %1330 = vmatpush.bf16.msra.mxu1 %v1230_v6  ;;  %1331 = vmatpush.bf16.msra.mxu2 %v1230_v6  ;;  %v995_v62 = vld [vmem:[%s1796_s0 + $0xd8] sm:$0xf]  ;;  %v1218_v63 = vld [vmem:[%s1796_s0 + $0xe8] sm:$0xf0] }
  0x1b   :  { %1332 = vmatpush.bf16.msra.mxu3 %v1230_v6  ;;  %586 = vmatpush.bf16.msra.mxu0 %v1230_v6  ;;  %v892_v6 = vor.u32 %v1190_v0, %v889_v1 }
  0x1e   :  { %1333 = vmatpush.bf16.msra.mxu1 %v1229_v7  ;;  %1334 = vmatpush.bf16.msra.mxu2 %v1229_v7 }
  0x1f   :  { %1335 = vmatpush.bf16.msra.mxu3 %v1229_v7  ;;  %587 = vmatpush.bf16.msra.mxu0 %v1229_v7  ;;  %v896_v7 = vor.u32 %v1193_v3, %v895_v2  ;;  %v992_v2 = vor.u32 %v1215_v60, %v989_v61  ;;  %v996_v3 = vor.u32 %v1218_v63, %v995_v62 }
  0x21   :  { %598 = vmatmul.bf16.vlgmr.msra.gmra.mxu1 %v920_v18  ;;  %608 = vmatmul.bf16.vlgmr.msra.gmra.mxu2 %v960_v19  ;;  %v912_v18 = vor.u32 %v1195_v12, %v909_v13  ;;  %v916_v19 = vor.u32 %v1198_v15, %v915_v14 }
  0x22   :  { %678 = vmatpush.bf16.msrb.mxu2 %v1252_v16  ;;  %629 = vmatpush.bf16.msrb.mxu1 %v1244_v17  ;;  %v904_v16 = vor.u32 %v1194_v8, %v901_v9  ;;  %v908_v17 = vor.u32 %v1197_v11, %v907_v10  ;;  %v1220_v8 = vld [vmem:[%s1796_s0 + $0xfc] sm:$0xf]  ;;  %v1009_v9 = vld [vmem:[%s1796_s0 + $0x10c] sm:$0xf0]  ;;  %v1015_v10 = vld [vmem:[%s1796_s0 + $0x100] sm:$0xf] }
  0x23   :  { %618 = vmatmul.bf16.vlgmr.msra.gmra.mxu3 %v1000_v20  ;;  %588 = vmatmul.bf16.vlgmr.msra.gmra.mxu0 %v880_v21  ;;  %v1199_v20 = vld [vmem:[%s1796_s0 + $0x54] sm:$0xf]  ;;  %v921_v21 = vld [vmem:[%s1796_s0 + $0x64] sm:$0xf0]  ;;  %v1012_v15 = vor.u32 %v1220_v8, %v1009_v9 }
  0x24   :  { %727 = vmatpush.bf16.msrb.mxu3 %v1260_v22  ;;  %780 = vmatpush.bf16.msrb.mxu0 %v1264_v23  ;;  %v927_v22 = vld [vmem:[%s1796_s0 + $0x58] sm:$0xf]  ;;  %v1202_v23 = vld [vmem:[%s1796_s0 + $0x68] sm:$0xf0]  ;;  %v1223_v11 = vld [vmem:[%s1796_s0 + $0x110] sm:$0xf0] }
  0x26   :  { %679 = vmatpush.bf16.msrb.mxu2 %v1251_v24  ;;  %630 = vmatpush.bf16.msrb.mxu1 %v1243_v25  ;;  %v1200_v24 = vld [vmem:[%s1796_s0 + $0x5c] sm:$0xf]  ;;  %v929_v25 = vld [vmem:[%s1796_s0 + $0x6c] sm:$0xf0] }
  0x28   :  { %728 = vmatpush.bf16.msrb.mxu3 %v1259_v26  ;;  %781 = vmatpush.bf16.msrb.mxu0 %v1263_v27  ;;  %v935_v26 = vld [vmem:[%s1796_s0 + $0x60] sm:$0xf]  ;;  %v1203_v27 = vld [vmem:[%s1796_s0 + $0x70] sm:$0xf0] }
  0x2a   :  { %680 = vmatpush.bf16.msrb.mxu2 %v1250_v28  ;;  %631 = vmatpush.bf16.msrb.mxu1 %v1242_v29  ;;  %v924_v28 = vor.u32 %v1199_v20, %v921_v21  ;;  %v928_v29 = vor.u32 %v1202_v23, %v927_v22 }
  0x2c   :  { %729 = vmatpush.bf16.msrb.mxu3 %v1258_v30  ;;  %782 = vmatpush.bf16.msrb.mxu0 %v1262_v31  ;;  %v932_v30 = vor.u32 %v1200_v24, %v929_v25  ;;  %v936_v31 = vor.u32 %v1203_v27, %v935_v26  ;;  %v1224_v25 = vld [vmem:[%s1796_s0 + $0x11c] sm:$0xf]  ;;  %v1021_v26 = vld [vmem:[%s1796_s0 + $0x12c] sm:$0xf0]  ;;  %v1027_v27 = vld [vmem:[%s1796_s0 + $0x120] sm:$0xf] }
  0x2d   :  { %v1024_v36 = vor.u32 %v1224_v25, %v1021_v26 }
  0x2e   :  { %681 = vmatpush.bf16.msrb.mxu2 %v1249_v32  ;;  %632 = vmatpush.bf16.msrb.mxu1 %v1241_v33  ;;  %v1204_v32 = vld [vmem:[%s1796_s0 + $0x7c] sm:$0xf]  ;;  %v941_v33 = vld [vmem:[%s1796_s0 + $0x8c] sm:$0xf0] }
  0x2f   :  { %v944_v40 = vor.u32 %v1204_v32, %v941_v33  ;;  %v1228_v32 = vld [vmem:[%s1796_s0 + $0x138] sm:$0xf0] }
  0x30   :  { %730 = vmatpush.bf16.msrb.mxu3 %v1257_v34  ;;  %783 = vmatpush.bf16.msrb.mxu0 %v1261_v43  ;;  %v947_v34 = vld [vmem:[%s1796_s0 + $0x80] sm:$0xf]  ;;  %v956_v43 = vor.u32 %v1208_v39, %v955_v38 }
  0x31   :  { %603 = vmatmul.bf16.gmra.mxu1 %v940_v46  ;;  %613 = vmatmul.bf16.gmra.mxu2 %v980_v47  ;;  %v948_v41 = vor.u32 %v1207_v35, %v947_v34  ;;  %v967_v46 = vld [vmem:[%s1796_s0 + $0xa8] sm:$0xf]  ;;  %v1212_v47 = vld [vmem:[%s1796_s0 + $0xb8] sm:$0xf0] }
  0x32   :  { %682 = vmatpush.bf16.msrb.mxu2 %v1248_v44  ;;  %633 = vmatpush.bf16.msrb.mxu1 %v1240_v45  ;;  %v1209_v44 = vld [vmem:[%s1796_s0 + $0xa4] sm:$0xf]  ;;  %v961_v45 = vld [vmem:[%s1796_s0 + $0xb4] sm:$0xf0] }
  0x33   :  { %623 = vmatmul.bf16.gmra.mxu3 %v1020_v48  ;;  %593 = vmatmul.bf16.gmra.mxu0 %v900_v49  ;;  %v1210_v48 = vld [vmem:[%s1796_s0 + $0xac] sm:$0xf]  ;;  %v969_v49 = vld [vmem:[%s1796_s0 + $0xbc] sm:$0xf0] }
  0x34   :  { %731 = vmatpush.bf16.msrb.mxu3 %v1256_v50  ;;  %v975_v50 = vld [vmem:[%s1796_s0 + $0xb0] sm:$0xf] }
  0x36   :  { %683 = vmatpush.bf16.msrb.mxu2 %v1247_v51  ;;  %634 = vmatpush.bf16.msrb.mxu1 %v1239_v52  ;;  %v1213_v51 = vld [vmem:[%s1796_s0 + $0xc0] sm:$0xf0]  ;;  %v964_v52 = vor.u32 %v1209_v44, %v961_v45 }
  0x38   :  { %732 = vmatpush.bf16.msrb.mxu3 %v1255_v53  ;;  %v968_v53 = vor.u32 %v1212_v47, %v967_v46 }
  0x3a   :  { %684 = vmatpush.bf16.msrb.mxu2 %v1246_v54  ;;  %635 = vmatpush.bf16.msrb.mxu1 %v1238_v55  ;;  %v972_v54 = vor.u32 %v1210_v48, %v969_v49  ;;  %v976_v55 = vor.u32 %v1213_v51, %v975_v50 }
  0x3c   :  { %733 = vmatpush.bf16.msrb.mxu3 %v1254_v56  ;;  %v1214_v56 = vld [vmem:[%s1796_s0 + $0xcc] sm:$0xf] }
  0x3e   :  { %685 = vmatpush.bf16.msrb.mxu2 %v1245_v57  ;;  %636 = vmatpush.bf16.msrb.mxu1 %v1237_v58  ;;  %v981_v57 = vld [vmem:[%s1796_s0 + $0xdc] sm:$0xf0]  ;;  %v987_v58 = vld [vmem:[%s1796_s0 + $0xd0] sm:$0xf] }
  0x3f   :  { %v984_v0 = vor.u32 %v1214_v56, %v981_v57 }
  0x40   :  { %734 = vmatpush.bf16.msrb.mxu3 %v1253_v59  ;;  %v1217_v59 = vld [vmem:[%s1796_s0 + $0xe0] sm:$0xf0] }
  0x41   :  { %637 = vmatmul.bf16.vlgmr.msrb.gmra.mxu1 %v884_v4  ;;  %686 = vmatmul.bf16.vlgmr.msrb.gmra.mxu2 %v888_v5  ;;  %v988_v1 = vor.u32 %v1217_v59, %v987_v58  ;;  %v1219_v4 = vld [vmem:[%s1796_s0 + $0xf4] sm:$0xf]  ;;  %v1001_v5 = vld [vmem:[%s1796_s0 + $0x104] sm:$0xf0] }
  0x42   :  { %v1004_v12 = vor.u32 %v1219_v4, %v1001_v5 }
  0x43   :  { %735 = vmatmul.bf16.vlgmr.msrb.gmra.mxu3 %v892_v6  ;;  %1181 = vmatmul.msk.bf16.vlgmr.msrb.gmra.mxu0 %vm555_vm0, %v896_v7  ;;  %v1007_v6 = vld [vmem:[%s1796_s0 + $0xf8] sm:$0xf]  ;;  %v1222_v7 = vld [vmem:[%s1796_s0 + $0x108] sm:$0xf0] }
  0x44   :  { %v1008_v13 = vor.u32 %v1222_v7, %v1007_v6 }
  0x51   :  { %642 = vmatmul.bf16.gmra.mxu1 %v904_v16  ;;  %691 = vmatmul.bf16.gmra.mxu2 %v908_v17  ;;  %v1016_v16 = vor.u32 %v1223_v11, %v1015_v10 }
  0x53   :  { %740 = vmatmul.bf16.gmra.mxu3 %v912_v18  ;;  %1182 = vmatmul.msk.bf16.gmra.mxu0 %vm555_vm0, %v916_v19  ;;  %v1693_v18 = vld [vmem:[%s1795_s2] ss:$0 sm:$0xff] }
  0x61   :  { %647 = vmatmul.bf16.gmra.mxu1 %v924_v28  ;;  %696 = vmatmul.bf16.gmra.mxu2 %v928_v29  ;;  %v1227_v28 = vld [vmem:[%s1796_s0 + $0x130] sm:$0xf0]  ;;  %v1225_v29 = vld [vmem:[%s1796_s0 + $0x124] sm:$0xf] }
  0x62   :  { %v1028_v37 = vor.u32 %v1227_v28, %v1027_v27 }
  0x63   :  { %745 = vmatmul.bf16.gmra.mxu3 %v932_v30  ;;  %1183 = vmatmul.msk.bf16.gmra.mxu0 %vm555_vm0, %v936_v31  ;;  %v1029_v30 = vld [vmem:[%s1796_s0 + $0x134] sm:$0xf0]  ;;  %v1035_v31 = vld [vmem:[%s1796_s0 + $0x128] sm:$0xf] }
  0x71   :  { %652 = vmatmul.bf16.gmra.mxu1 %v944_v40  ;;  %701 = vmatmul.bf16.gmra.mxu2 %v948_v41  ;;  %v1032_v40 = vor.u32 %v1225_v29, %v1029_v30  ;;  %v1036_v41 = vor.u32 %v1228_v32, %v1035_v31 }
  0x73   :  { %750 = vmatmul.bf16.gmra.mxu3 %v952_v42  ;;  %1184 = vmatmul.msk.bf16.gmra.mxu0 %vm555_vm0, %v956_v43 }
  0x81   :  { %657 = vmatmul.bf16.gmra.mxu1 %v964_v52  ;;  %706 = vmatmul.bf16.gmra.mxu2 %v968_v53 }
  0x83   :  { %755 = vmatmul.bf16.gmra.mxu3 %v972_v54  ;;  %1185 = vmatmul.msk.bf16.gmra.mxu0 %vm555_vm0, %v976_v55 }
  0x91   :  { %662 = vmatmul.bf16.gmra.mxu1 %v984_v0  ;;  %711 = vmatmul.bf16.gmra.mxu2 %v988_v1 }
  0x93   :  { %760 = vmatmul.bf16.gmra.mxu3 %v992_v2  ;;  %1186 = vmatmul.msk.bf16.gmra.mxu0 %vm555_vm0, %v996_v3 }
  0x9e   :  { %v1687_v14 = vpop.f32.mrf.mxu1 }
  0xa0   :  { %v589_v17 = vpop.f32.mrf.mxu0 }
  0xa1   :  { %667 = vmatmul.bf16.gmra.mxu1 %v1004_v12  ;;  %716 = vmatmul.bf16.gmra.mxu2 %v1008_v13  ;;  %v590_v55 = vadd.f32 %v1693_v18, %v589_v17 }
  0xa3   :  { %765 = vmatmul.bf16.gmra.mxu3 %v1012_v15  ;;  %1187 = vmatmul.msk.bf16.gmra.mxu0 %vm555_vm0, %v1016_v16 }
  0xa4   :  { %v609_v19 = vpop.f32.mrf.mxu2 }
  0xa5   :  { %v1696_v20 = vadd.f32 %v1693_v18, %v609_v19 }
  0xa6   :  { %v619_v21 = vpop.f32.mrf.mxu3  ;;  %v1701_v23 = vpop.f32.mrf.mxu1 }
  0xa7   :  { %v1699_v22 = vadd.f32 %v1693_v18, %v619_v21 }
  0xa8   :  { %v591_v24 = vpop.f32.mrf.mxu0 }
  0xa9   :  { %v592_v62 = vadd.f32 %v1693_v18, %v591_v24 }
  0xac   :  { %v611_v33 = vpop.f32.mrf.mxu2 }
  0xad   :  { %v1728_v34 = vadd.f32 %v1693_v18, %v611_v33 }
  0xae   :  { %v621_v35 = vpop.f32.mrf.mxu3  ;;  %v1733_v39 = vpop.f32.mrf.mxu1 }
  0xaf   :  { %v1731_v38 = vadd.f32 %v1693_v18, %v621_v35 }
  0xb0   :  { %v594_v42 = vpop.f32.mrf.mxu0 }
  0xb1   :  { %672 = vmatmul.bf16.gmra.mxu1 %v1024_v36  ;;  %721 = vmatmul.bf16.gmra.mxu2 %v1028_v37  ;;  %v595_v9 = vadd.f32 %v1693_v18, %v594_v42  ;;  %v600_v36 = vadd.f32 %v1693_v18, %v1687_v14 }
  0xb3   :  { %770 = vmatmul.bf16.gmra.mxu3 %v1032_v40  ;;  %1188 = vmatmul.msk.bf16.gmra.mxu0 %vm555_vm0, %v1036_v41 }
  0xb4   :  { %v614_v43 = vpop.f32.mrf.mxu2 }
  0xb5   :  { %v1737_v44 = vadd.f32 %v1693_v18, %v614_v43 }
  0xb6   :  { %v624_v45 = vpop.f32.mrf.mxu3  ;;  %v1742_v47 = vpop.f32.mrf.mxu1 }
  0xb7   :  { %v1740_v46 = vadd.f32 %v1693_v18, %v624_v45 }
  0xb8   :  { %v596_v48 = vpop.f32.mrf.mxu0 }
  0xb9   :  { %v597_v24 = vadd.f32 %v1693_v18, %v596_v48 }
  0xbc   :  { %v616_v49 = vpop.f32.mrf.mxu2 }
  0xbd   :  { %v1745_v50 = vadd.f32 %v1693_v18, %v616_v49 }
  0xbe   :  { %v626_v51 = vpop.f32.mrf.mxu3  ;;  %v638_v53 = vpop.f32.mrf.mxu1 }
  0xbf   :  { %v1748_v52 = vadd.f32 %v1693_v18, %v626_v51  ;;  %v639_v57 = vadd.f32 %v638_v53, %v590_v55  ;;  %v602_v53 = vadd.f32 %v1693_v18, %v1701_v23 }
  0xc0   :  { %v785_v54 = vpop.f32.mrf.mxu0 }
  0xc4   :  { %v687_v56 = vpop.f32.mrf.mxu2 }
  0xc5   :  { %v688_v60 = vadd.f32 %v687_v56, %v639_v57 }
  0xc6   :  { %v736_v58 = vpop.f32.mrf.mxu3  ;;  %v640_v59 = vpop.f32.mrf.mxu1 }
  0xc7   :  { %v737_v63 = vadd.f32 %v736_v58, %v688_v60  ;;  %v641_v0 = vadd.f32 %v640_v59, %v592_v62 }
  0xc8   :  { %v787_v61 = vpop.f32.mrf.mxu0 }
  0xc9   :  { %v786_v5 = vadd.f32 %v785_v54, %v737_v63  ;;  %v605_v63 = vadd.f32 %v1693_v18, %v1733_v39 }
  0xcb   :  { %v825_v10 = vmax.f32 %v786_v5, 0.0 }
  0xcc   :  { %v689_v1 = vpop.f32.mrf.mxu2 }
  0xcd   :  { %v690_v2 = vadd.f32 %v689_v1, %v641_v0 }
  0xce   :  { %v738_v3 = vpop.f32.mrf.mxu3  ;;  %v643_v4 = vpop.f32.mrf.mxu1 }
  0xcf   :  { %v739_v6 = vadd.f32 %v738_v3, %v690_v2  ;;  %v644_v15 = vadd.f32 %v643_v4, %v595_v9 }
  0xd0   :  { %v790_v7 = vpop.f32.mrf.mxu0 }
  0xd1   :  { %v788_v8 = vadd.f32 %v787_v61, %v739_v6 }
  0xd3   :  { %v826_v11 = vmax.f32 %v788_v8, 0.0  ;;  %v607_v8 = vadd.f32 %v1693_v18, %v1742_v47 }
  0xd4   :  { %v692_v12 = vpop.f32.mrf.mxu2 }
  0xd5   :  { %v1268_v13 = vpack.c.bf16 %v826_v11, %v825_v10  ;;  %v693_v19 = vadd.f32 %v692_v12, %v644_v15 }
  0xd6   :  { %v741_v16 = vpop.f32.mrf.mxu3  ;;  %v645_v17 = vpop.f32.mrf.mxu1 }
  0xd7   :  { %1269 = vst [vmem:[%s1797_s3] sm:$0xff] %v1268_v13   ;;  %v742_v25 = vadd.f32 %v741_v16, %v693_v19  ;;  %v646_v26 = vadd.f32 %v645_v17, %v597_v24 }
  0xd8   :  { %v792_v21 = vpop.f32.mrf.mxu0 }
  0xd9   :  { %v791_v31 = vadd.f32 %v790_v7, %v742_v25 }
  0xdb   :  { %v827_v37 = vmax.f32 %v791_v31, 0.0 }
  0xdc   :  { %v694_v27 = vpop.f32.mrf.mxu2 }
  0xdd   :  { %v695_v28 = vadd.f32 %v694_v27, %v646_v26 }
  0xde   :  { %v743_v29 = vpop.f32.mrf.mxu3  ;;  %v648_v30 = vpop.f32.mrf.mxu1 }
  0xdf   :  { %v744_v32 = vadd.f32 %v743_v29, %v695_v28  ;;  %v649_v43 = vadd.f32 %v648_v30, %v600_v36 }
  0xe0   :  { %v795_v33 = vpop.f32.mrf.mxu0 }
  0xe1   :  { %v793_v35 = vadd.f32 %v792_v21, %v744_v32 }
  0xe3   :  { %v828_v40 = vmax.f32 %v793_v35, 0.0 }
  0xe4   :  { %v697_v41 = vpop.f32.mrf.mxu2 }
  0xe5   :  { %v1273_v42 = vpack.c.bf16 %v828_v40, %v827_v37  ;;  %v698_v49 = vadd.f32 %v697_v41, %v649_v43 }
  0xe6   :  { %v746_v45 = vpop.f32.mrf.mxu3  ;;  %v650_v48 = vpop.f32.mrf.mxu1 }
  0xe7   :  { %1305 = vst [vmem:[%s1797_s3 + $0x8] sm:$0xff] %v1273_v42   ;;  %v747_v54 = vadd.f32 %v746_v45, %v698_v49  ;;  %v651_v55 = vadd.f32 %v650_v48, %v602_v53 }
  0xe8   :  { %v797_v51 = vpop.f32.mrf.mxu0 }
  0xe9   :  { %v796_v59 = vadd.f32 %v795_v33, %v747_v54 }
  0xeb   :  { %v829_v0 = vmax.f32 %v796_v59, 0.0 }
  0xec   :  { %v699_v56 = vpop.f32.mrf.mxu2 }
  0xed   :  { %v700_v14 = vadd.f32 %v699_v56, %v651_v55 }
  0xee   :  { %v748_v57 = vpop.f32.mrf.mxu3  ;;  %v653_v58 = vpop.f32.mrf.mxu1 }
  0xef   :  { %v749_v60 = vadd.f32 %v748_v57, %v700_v14  ;;  %v654_v4 = vadd.f32 %v653_v58, %v605_v63 }
  0xf0   :  { %v800_v61 = vpop.f32.mrf.mxu0 }
  0xf1   :  { %v798_v62 = vadd.f32 %v797_v51, %v749_v60 }
  0xf3   :  { %v830_v1 = vmax.f32 %v798_v62, 0.0 }
  0xf4   :  { %v702_v2 = vpop.f32.mrf.mxu2 }
  0xf5   :  { %v1278_v3 = vpack.c.bf16 %v830_v1, %v829_v0  ;;  %v703_v6 = vadd.f32 %v702_v2, %v654_v4 }
  0xf6   :  { %v751_v5 = vpop.f32.mrf.mxu3  ;;  %v655_v23 = vpop.f32.mrf.mxu1 }
  0xf7   :  { %1306 = vst [vmem:[%s1797_s3 + $0x10] sm:$0xff] %v1278_v3   ;;  %v752_v9 = vadd.f32 %v751_v5, %v703_v6  ;;  %v656_v10 = vadd.f32 %v655_v23, %v607_v8 }
  0xf8   :  { %v802_v7 = vpop.f32.mrf.mxu0 }
  0xf9   :  { %v801_v15 = vadd.f32 %v800_v61, %v752_v9 }
  0xfb   :  { %v831_v21 = vmax.f32 %v801_v15, 0.0 }
  0xfc   :  { %v704_v11 = vpop.f32.mrf.mxu2 }
  0xfd   :  { %v705_v39 = vadd.f32 %v704_v11, %v656_v10 }
  0xfe   :  { %v753_v12 = vpop.f32.mrf.mxu3  ;;  %v658_v13 = vpop.f32.mrf.mxu1 }
  0xff   :  { %v754_v16 = vadd.f32 %v753_v12, %v705_v39  ;;  %v659_v27 = vadd.f32 %v658_v13, %v1696_v20 }
 0x100   :  { %v805_v17 = vpop.f32.mrf.mxu0 }
 0x101   :  { %v803_v19 = vadd.f32 %v802_v7, %v754_v16 }
 0x103   :  { %v832_v24 = vmax.f32 %v803_v19, 0.0 }
 0x104   :  { %v707_v25 = vpop.f32.mrf.mxu2 }
 0x105   :  { %v1283_v26 = vpack.c.bf16 %v832_v24, %v831_v21  ;;  %v708_v18 = vadd.f32 %v707_v25, %v659_v27 }
 0x106   :  { %v756_v28 = vpop.f32.mrf.mxu3  ;;  %v660_v29 = vpop.f32.mrf.mxu1 }
 0x107   :  { %1307 = vst [vmem:[%s1797_s3 + $0x18] sm:$0xff] %v1283_v26   ;;  %v757_v30 = vadd.f32 %v756_v28, %v708_v18  ;;  %v661_v31 = vadd.f32 %v660_v29, %v1728_v34 }
 0x108   :  { %v807_v47 = vpop.f32.mrf.mxu0 }
 0x109   :  { %v806_v37 = vadd.f32 %v805_v17, %v757_v30 }
 0x10b   :  { %v833_v20 = vmax.f32 %v806_v37, 0.0 }
 0x10c   :  { %v709_v32 = vpop.f32.mrf.mxu2 }
 0x10d   :  { %v710_v33 = vadd.f32 %v709_v32, %v661_v31 }
 0x10e   :  { %v758_v35 = vpop.f32.mrf.mxu3  ;;  %v663_v36 = vpop.f32.mrf.mxu1 }
 0x10f   :  { %v759_v40 = vadd.f32 %v758_v35, %v710_v33  ;;  %v664_v49 = vadd.f32 %v663_v36, %v1737_v44 }
 0x110   :  { %v810_v41 = vpop.f32.mrf.mxu0 }
 0x111   :  { %v808_v42 = vadd.f32 %v807_v47, %v759_v40 }
 0x113   :  { %v834_v43 = vmax.f32 %v808_v42, 0.0 }
 0x114   :  { %v712_v45 = vpop.f32.mrf.mxu2 }
 0x115   :  { %v1288_v48 = vpack.c.bf16 %v834_v43, %v833_v20  ;;  %v713_v34 = vadd.f32 %v712_v45, %v664_v49 }
 0x116   :  { %v761_v51 = vpop.f32.mrf.mxu3  ;;  %v665_v53 = vpop.f32.mrf.mxu1 }
 0x117   :  { %1308 = vst [vmem:[%s1797_s3 + $0x20] sm:$0xff] %v1288_v48   ;;  %v762_v55 = vadd.f32 %v761_v51, %v713_v34  ;;  %v666_v56 = vadd.f32 %v665_v53, %v1745_v50 }
 0x118   :  { %v812_v54 = vpop.f32.mrf.mxu0 }
 0x119   :  { %v811_v60 = vadd.f32 %v810_v41, %v762_v55 }
 0x11b   :  { %v835_v44 = vmax.f32 %v811_v60, 0.0 }
 0x11c   :  { %v714_v14 = vpop.f32.mrf.mxu2 }
 0x11d   :  { %v715_v57 = vadd.f32 %v714_v14, %v666_v56 }
 0x11e   :  { %v763_v58 = vpop.f32.mrf.mxu3  ;;  %v668_v59 = vpop.f32.mrf.mxu1 }
 0x11f   :  { %v764_v61 = vadd.f32 %v763_v58, %v715_v57  ;;  %v669_v3 = vadd.f32 %v668_v59, %v1699_v22 }
 0x120   :  { %v815_v63 = vpop.f32.mrf.mxu0 }
 0x121   :  { %v813_v62 = vadd.f32 %v812_v54, %v764_v61 }
 0x123   :  { %v836_v0 = vmax.f32 %v813_v62, 0.0 }
 0x124   :  { %v717_v1 = vpop.f32.mrf.mxu2 }
 0x125   :  { %v1293_v2 = vpack.c.bf16 %v836_v0, %v835_v44  ;;  %v718_v50 = vadd.f32 %v717_v1, %v669_v3 }
 0x126   :  { %v766_v4 = vpop.f32.mrf.mxu3  ;;  %v670_v5 = vpop.f32.mrf.mxu1 }
 0x127   :  { %1309 = vst [vmem:[%s1797_s3 + $0x28] sm:$0xff] %v1293_v2   ;;  %v767_v23 = vadd.f32 %v766_v4, %v718_v50  ;;  %v671_v6 = vadd.f32 %v670_v5, %v1731_v38 }
 0x128   :  { %v817_v7 = vpop.f32.mrf.mxu0 }
 0x129   :  { %v816_v39 = vadd.f32 %v815_v63, %v767_v23 }
 0x12b   :  { %v837_v15 = vmax.f32 %v816_v39, 0.0 }
 0x12c   :  { %v719_v8 = vpop.f32.mrf.mxu2 }
 0x12d   :  { %v720_v9 = vadd.f32 %v719_v8, %v671_v6 }
 0x12e   :  { %v768_v10 = vpop.f32.mrf.mxu3  ;;  %v673_v11 = vpop.f32.mrf.mxu1 }
 0x12f   :  { %v769_v12 = vadd.f32 %v768_v10, %v720_v9  ;;  %v674_v19 = vadd.f32 %v673_v11, %v1740_v46 }
 0x130   :  { %v820_v24 = vpop.f32.mrf.mxu0 }
 0x131   :  { %v818_v13 = vadd.f32 %v817_v7, %v769_v12 }
 0x133   :  { %v838_v22 = vmax.f32 %v818_v13, 0.0 }
 0x134   :  { %v722_v16 = vpop.f32.mrf.mxu2 }
 0x135   :  { %v1298_v17 = vpack.c.bf16 %v838_v22, %v837_v15  ;;  %v723_v38 = vadd.f32 %v722_v16, %v674_v19 }
 0x136   :  { %v771_v21 = vpop.f32.mrf.mxu3  ;;  %v675_v25 = vpop.f32.mrf.mxu1 }
 0x137   :  { %1310 = vst [vmem:[%s1797_s3 + $0x30] sm:$0xff] %v1298_v17   ;;  %v772_v26 = vadd.f32 %v771_v21, %v723_v38  ;;  %v676_v27 = vadd.f32 %v675_v25, %v1748_v52 }
 0x138   :  { %v822_v31 = vpop.f32.mrf.mxu0 }
 0x139   :  { %v821_v47 = vadd.f32 %v820_v24, %v772_v26 }
 0x13b   :  { %v839_v33 = vmax.f32 %v821_v47, 0.0 }
 0x13c   :  { %v724_v28 = vpop.f32.mrf.mxu2 }
 0x13d   :  { %v725_v29 = vadd.f32 %v724_v28, %v676_v27 }
 0x13e   :  { %v773_v18 = vpop.f32.mrf.mxu3 }
 0x13f   :  { %v774_v30 = vadd.f32 %v773_v18, %v725_v29 }
 0x141   :  { %v823_v32 = vadd.f32 %v822_v31, %v774_v30 }
 0x143   :  { %v840_v46 = vmax.f32 %v823_v32, 0.0 }
 0x145   :  { %v1303_v35 = vpack.c.bf16 %v840_v46, %v839_v33 }
 0x147   :  { %1311 = vst [vmem:[%s1797_s3 + $0x38] sm:$0xff] %v1303_v35  }

// kernel: rgb_encoder_forward.7
= control target key start
LH: loop header
LB: loop body
LE: loop exit
PB: predicated region body
PF: predicated region fallthrough
CT: control target
= control target key end

     0   :  { %v278_v1 = vmov 16.0   ;;  %s342_s0 = inlined_call_operand.vmem [shape: bf16[4,16,128], index: 0, kind: input, shape index: {}]   ;;  %s343_s1 = inlined_call_operand.vmem [shape: bf16[128,128], index: 1, kind: input, shape index: {}]   ;;  %s344_s2 = inlined_call_operand.vmem [shape: f32[1,128], index: 2, kind: input, shape index: {}]   ;;  %s345_s3 = inlined_call_operand.hbm [shape: f32[4,128], index: 3, kind: output, shape index: {}]  }
   0x1   :  { %v227_v0 = vld [vmem:[%s343_s1 + $0x38] sm:$0xff]  ;;  %250 = vrcp.f32 %v278_v1  ;;  %v226_v2 = vld [vmem:[%s343_s1 + $0x30] sm:$0xff]  ;;  %v229_v3 = vld [vmem:[%s342_s0] sm:$0xff]  }
   0x2   :  { %158 = vmatpush.bf16.msra.mxu0 %v227_v0  ;;  %v230_v4 = vunpack.c.l.bf16 %v229_v3  ;;  %v231_v5 = vunpack.c.h.bf16 %v229_v3  ;;  %v244_v6 = vld [vmem:[%s342_s0 + $0x8] sm:$0xff]   ;;  %v245_v7 = vld [vmem:[%s342_s0 + $0x10] sm:$0xff]   ;;  %v246_v8 = vld [vmem:[%s342_s0 + $0x18] sm:$0xff]  }
   0x3   :  { %v234_v9 = vunpack.c.l.bf16 %v244_v6  ;;  %v235_v10 = vunpack.c.h.bf16 %v244_v6  ;;  %v238_v11 = vunpack.c.l.bf16 %v245_v7  ;;  %v239_v12 = vunpack.c.h.bf16 %v245_v7 }
   0x4   :  { %8 = vsyncpa [#allocation3], 0  ;;  %v242_v13 = vunpack.c.l.bf16 %v246_v8  ;;  %v243_v14 = vunpack.c.h.bf16 %v246_v8  ;;  %v31_v15 = vadd.f32 %v231_v5, %v230_v4  ;;  %v225_v16 = vld [vmem:[%s343_s1 + $0x28] sm:$0xff]  ;;  %v224_v27 = vld [vmem:[%s343_s1 + $0x20] sm:$0xff]  ;;  %vm102_vm1 = vcmask 1041409   ;;  %s279_s10 = smov [#allocation2]  }
   0x5   :  { %v38_v17 = vadd.f32 %v235_v10, %v234_v9  ;;  %v45_v18 = vadd.f32 %v239_v12, %v238_v11  ;;  %v223_v38 = vld [vmem:[%s343_s1 + $0x18] sm:$0xff]  ;;  %v222_v49 = vld [vmem:[%s343_s1 + $0x10] sm:$0xff]  ;;  %v221_v58 = vld [vmem:[%s343_s1 + $0x8] sm:$0xff]  ;;  %vm104_vm2 = vcmask 1042434   ;;  %vm106_vm3 = vcmask 1043459   ;;  %s177_s11 = sshll.u32 %s279_s10, 4  ;;  %s178_s11 = int_to_ptr.vmem [resolvable:$true] %s177_s11 }
   0x6   :  { %159 = vmatpush.bf16.msra.mxu0 %v226_v2  ;;  %v32_v20 = vrot.slane %v31_v15, 4  ;;  %v52_v21 = vadd.f32 %v243_v14, %v242_v13  ;;  %v220_v2 = vld [vmem:[%s343_s1] sm:$0xff]  ;;  %s179_s14 = sshll.u32 %s345_s3, 4  ;;  %s180_s14 = int_to_ptr.hbm [resolvable:$true] %s179_s14 }
   0x7   :  { %v251_v19 = vpop.eup %250  ;;  %v39_v22 = vrot.slane %v38_v17, 4  ;;  %v46_v23 = vrot.slane %v45_v18, 4  ;;  %v249_v7 = vld [vmem:[%s344_s2] ss:$0 sm:$0xff] }
   0x8   :  { %v60_v24 = vmul.f32 16.0, %v251_v19  ;;  %v33_v25 = vadd.f32 %v32_v20, %v31_v15  ;;  %v53_v26 = vrot.slane %v52_v21, 4  ;;  %vm64_vm0 = vweird.f32 %v251_v19 }
   0x9   :  { %v40_v28 = vadd.f32 %v39_v22, %v38_v17  ;;  %v47_v29 = vadd.f32 %v46_v23, %v45_v18 }
   0xa   :  { %160 = vmatpush.bf16.msra.mxu0 %v225_v16  ;;  %v61_v30 = vsub.f32 1.0, %v60_v24  ;;  %v34_v31 = vrot.slane %v33_v25, 2  ;;  %v54_v32 = vadd.f32 %v53_v26, %v52_v21 }
   0xb   :  { %v41_v33 = vrot.slane %v40_v28, 2  ;;  %v48_v34 = vrot.slane %v47_v29, 2 }
   0xc   :  { %v62_v35 = vmul.f32 %v251_v19, %v61_v30  ;;  %v35_v36 = vadd.f32 %v34_v31, %v33_v25  ;;  %v55_v37 = vrot.slane %v54_v32, 2 }
   0xd   :  { %v42_v39 = vadd.f32 %v41_v33, %v40_v28  ;;  %v49_v40 = vadd.f32 %v48_v34, %v47_v29 }
   0xe   :  { %161 = vmatpush.bf16.msra.mxu0 %v224_v27  ;;  %v63_v41 = vadd.f32 %v251_v19, %v62_v35  ;;  %v36_v42 = vrot.slane %v35_v36, 1  ;;  %v56_v43 = vadd.f32 %v55_v37, %v54_v32 }
   0xf   :  { %v43_v44 = vrot.slane %v42_v39, 1  ;;  %v50_v45 = vrot.slane %v49_v40, 1 }
  0x10   :  { %v65_v46 = vsel %vm64_vm0, %v251_v19, %v63_v41  ;;  %v37_v47 = vadd.f32 %v36_v42, %v35_v36  ;;  %v57_v48 = vrot.slane %v56_v43, 1 }
  0x11   :  { %v44_v50 = vadd.f32 %v43_v44, %v42_v39  ;;  %v51_v51 = vadd.f32 %v50_v45, %v49_v40 }
  0x12   :  { %162 = vmatpush.bf16.msra.mxu0 %v223_v38  ;;  %v58_v52 = vadd.f32 %v57_v48, %v56_v43  ;;  %v66_v53 = vmul.f32 %v65_v46, %v37_v47 }
  0x13   :  { %v67_v54 = vmul.f32 %v65_v46, %v44_v50  ;;  %v68_v55 = vmul.f32 %v65_v46, %v51_v51 }
  0x14   :  { %v69_v56 = vmul.f32 %v65_v46, %v58_v52  ;;  %v70_v57 = vpack.c.bf16 %v66_v53, %v66_v53 }
  0x15   :  { %v71_v59 = vpack.c.bf16 %v67_v54, %v67_v54  ;;  %v72_v60 = vpack.c.bf16 %v68_v55, %v68_v55 }
  0x16   :  { %163 = vmatpush.bf16.msra.mxu0 %v222_v49  ;;  %v73_v61 = vpack.c.bf16 %v69_v56, %v69_v56  ;;  %v98_v62 = vunpack.c.l.b16 %v70_v57 }
  0x17   :  { %v99_v63 = vunpack.c.l.b16 %v71_v59  ;;  %v100_v0 = vunpack.c.l.b16 %v72_v60 }
  0x18   :  { %v101_v1 = vunpack.c.l.b16 %v73_v61 }
  0x19   :  { %v103_v3 = vsel %vm102_vm1, %v99_v63, %v98_v62 }
  0x1a   :  { %164 = vmatpush.bf16.msra.mxu0 %v221_v58  ;;  %v105_v4 = vsel %vm104_vm2, %v100_v0, %v103_v3 }
  0x1b   :  { %v107_v5 = vsel %vm106_vm3, %v101_v1, %v105_v4 }
  0x1c   :  { %v108_v6 = vpack.c.b16 %v107_v5, %v107_v5 }
  0x1e   :  { %165 = vmatpush.bf16.msra.mxu0 %v220_v2 }
  0x21   :  { %166 = vmatmul.bf16.vlgmr.msra.gmra.mxu0 %v108_v6 }
  0x9e   :  { %v167_v8 = vpop.f32.mrf.mxu0 }
  0x9f   :  { %v168_v9 = vadd.f32 %v249_v7, %v167_v8 }
  0xa1   :  { %171 = vst [vmem:[#allocation2] sm:$0xf] %v168_v9 }
  0xa2   :  { %182 = dma.vmem_to_hbm [thread:$0]  %s178_s11, 64, %s180_s14, [#allocation3]  }
  0xa6   :  { %v169_v10 = vpop.f32.mrf.mxu0 }
  0xa7   :  { %276 = dma.done.wait [#allocation3], 64  }
  0xa8   :  { %277 = vsyncadd [#allocation3], 4294967232 }
  0xa9   :  { %187 = vsyncpa [#allocation3], 1 }

// kernel: rgb_encoder_forward.6
= control target key start
LH: loop header
LB: loop body
LE: loop exit
PB: predicated region body
PF: predicated region fallthrough
CT: control target
= control target key end

     0   :  { %vm431_vm0 = vcmask 523264   ;;  %s1224_s1 = inlined_call_operand.vmem [shape: bf16[576,128], index: 1, kind: input, shape index: {}]   ;;  %s1225_s2 = inlined_call_operand.vmem [shape: f32[1,128], index: 2, kind: input, shape index: {}]   ;;  %s1226_s0 = inlined_call_operand.vmem [shape: bf16[64,576], index: 0, kind: input, shape index: {}]   ;;  %s1227_s3 = inlined_call_operand.vmem [shape: bf16[64,128], index: 3, kind: output, shape index: {}]  }
   0x1   :  { %v872_v0 = vld [vmem:[%s1224_s1 + $0x38] sm:$0xff]  ;;  %v871_v1 = vld [vmem:[%s1224_s1 + $0x30] sm:$0xff]  ;;  %v870_v4 = vld [vmem:[%s1224_s1 + $0x28] sm:$0xff] }
   0x2   :  { %924 = vmatpush.bf16.msra.mxu1 %v872_v0  ;;  %925 = vmatpush.bf16.msra.mxu2 %v872_v0  ;;  %v896_v2 = vld [vmem:[%s1224_s1 + $0xf8] sm:$0xff]  ;;  %v895_v3 = vld [vmem:[%s1224_s1 + $0xf0] sm:$0xff]  ;;  %v894_v5 = vld [vmem:[%s1224_s1 + $0xe8] sm:$0xff] }
   0x3   :  { %444 = vmatpush.bf16.msra.mxu0 %v872_v0  ;;  %531 = vmatpush.bf16.msra.mxu3 %v896_v2  ;;  %v869_v6 = vld [vmem:[%s1224_s1 + $0x20] sm:$0xff]  ;;  %v868_v8 = vld [vmem:[%s1224_s1 + $0x18] sm:$0xff]  ;;  %v867_v10 = vld [vmem:[%s1224_s1 + $0x10] sm:$0xff] }
   0x4   :  { %v893_v7 = vld [vmem:[%s1224_s1 + $0xe0] sm:$0xff]  ;;  %v892_v9 = vld [vmem:[%s1224_s1 + $0xd8] sm:$0xff]  ;;  %v891_v11 = vld [vmem:[%s1224_s1 + $0xd0] sm:$0xff] }
   0x5   :  { %v866_v12 = vld [vmem:[%s1224_s1 + $0x8] sm:$0xff]  ;;  %v865_v14 = vld [vmem:[%s1224_s1] sm:$0xff]  ;;  %v852_v16 = vld [vmem:[%s1226_s0 + $0x38] sm:$0xf0] }
   0x6   :  { %926 = vmatpush.bf16.msra.mxu1 %v871_v1  ;;  %927 = vmatpush.bf16.msra.mxu2 %v871_v1  ;;  %v890_v13 = vld [vmem:[%s1224_s1 + $0xc8] sm:$0xff]  ;;  %v679_v17 = vld [vmem:[%s1226_s0 + $0x78] sm:$0xf]  ;;  %v619_v21 = vld [vmem:[%s1226_s0] sm:$0xf] }
   0x7   :  { %445 = vmatpush.bf16.msra.mxu0 %v871_v1  ;;  %532 = vmatpush.bf16.msra.mxu3 %v895_v3  ;;  %v639_v15 = vld [vmem:[%s1226_s0 + $0x28] sm:$0xf]  ;;  %v862_v18 = vld [vmem:[%s1226_s0 + $0x88] sm:$0xf0]  ;;  %v888_v19 = vld [vmem:[%s1224_s1 + $0xb8] sm:$0xff] }
   0x8   :  { %v880_v20 = vld [vmem:[%s1224_s1 + $0x78] sm:$0xff]  ;;  %v889_v22 = vld [vmem:[%s1224_s1 + $0xc0] sm:$0xff]  ;;  %v640_v23 = vor.u32 %v852_v16, %v639_v15  ;;  %v680_v24 = vor.u32 %v862_v18, %v679_v17  ;;  %v847_v25 = vld [vmem:[%s1226_s0 + $0x10] sm:$0xf0] }
   0x9   :  { %v846_v26 = vld [vmem:[%s1226_s0 + $0xc] sm:$0xf]  ;;  %v629_v27 = vld [vmem:[%s1226_s0 + $0x1c] sm:$0xf0]  ;;  %v900_v28 = vld [vmem:[%s1224_s1 + $0x118] sm:$0xff]  ;;  %v620_v31 = vor.u32 %v847_v25, %v619_v21 }
   0xa   :  { %928 = vmatpush.bf16.msra.mxu1 %v870_v4  ;;  %929 = vmatpush.bf16.msra.mxu2 %v870_v4  ;;  %v887_v29 = vld [vmem:[%s1224_s1 + $0xb0] sm:$0xff]  ;;  %v632_v32 = vor.u32 %v846_v26, %v629_v27  ;;  %v886_v34 = vld [vmem:[%s1224_s1 + $0xa8] sm:$0xff]  ;;  %v885_v37 = vld [vmem:[%s1224_s1 + $0xa0] sm:$0xff] }
   0xb   :  { %446 = vmatpush.bf16.msra.mxu0 %v870_v4  ;;  %533 = vmatpush.bf16.msra.mxu3 %v894_v5  ;;  %v879_v30 = vld [vmem:[%s1224_s1 + $0x70] sm:$0xff]  ;;  %v878_v35 = vld [vmem:[%s1224_s1 + $0x68] sm:$0xff]  ;;  %v877_v38 = vld [vmem:[%s1224_s1 + $0x60] sm:$0xff] }
   0xc   :  { %v899_v33 = vld [vmem:[%s1224_s1 + $0x110] sm:$0xff]  ;;  %v898_v36 = vld [vmem:[%s1224_s1 + $0x108] sm:$0xff]  ;;  %v857_v40 = vld [vmem:[%s1226_s0 + $0x60] sm:$0xf0] }
   0xd   :  { %v659_v39 = vld [vmem:[%s1226_s0 + $0x50] sm:$0xf]  ;;  %v897_v41 = vld [vmem:[%s1224_s1 + $0x100] sm:$0xff]  ;;  %v884_v42 = vld [vmem:[%s1224_s1 + $0x98] sm:$0xff] }
   0xe   :  { %930 = vmatpush.bf16.msra.mxu1 %v869_v6  ;;  %931 = vmatpush.bf16.msra.mxu2 %v869_v6  ;;  %v876_v43 = vld [vmem:[%s1224_s1 + $0x58] sm:$0xff]  ;;  %v635_v44 = vld [vmem:[%s1226_s0 + $0x10] sm:$0xf]  ;;  %v660_v45 = vor.u32 %v857_v40, %v659_v39  ;;  %v849_v46 = vld [vmem:[%s1226_s0 + $0x20] sm:$0xf0] }
   0xf   :  { %447 = vmatpush.bf16.msra.mxu0 %v869_v6  ;;  %534 = vmatpush.bf16.msra.mxu3 %v893_v7  ;;  %v851_v47 = vld [vmem:[%s1226_s0 + $0x34] sm:$0xf]  ;;  %v649_v48 = vld [vmem:[%s1226_s0 + $0x44] sm:$0xf0]  ;;  %v636_v51 = vor.u32 %v849_v46, %v635_v44  ;;  %v881_v55 = vld [vmem:[%s1224_s1 + $0x80] sm:$0xff] }
  0x10   :  { %v883_v49 = vld [vmem:[%s1224_s1 + $0x90] sm:$0xff]  ;;  %v652_v52 = vor.u32 %v851_v47, %v649_v48  ;;  %v882_v53 = vld [vmem:[%s1224_s1 + $0x88] sm:$0xff]  ;;  %v873_v56 = vld [vmem:[%s1224_s1 + $0x40] sm:$0xff] }
  0x11   :  { %v875_v50 = vld [vmem:[%s1224_s1 + $0x50] sm:$0xff]  ;;  %v874_v54 = vld [vmem:[%s1224_s1 + $0x48] sm:$0xff]  ;;  %v848_v58 = vld [vmem:[%s1226_s0 + $0x18] sm:$0xf0] }
  0x12   :  { %932 = vmatpush.bf16.msra.mxu1 %v868_v8  ;;  %933 = vmatpush.bf16.msra.mxu2 %v868_v8  ;;  %v627_v57 = vld [vmem:[%s1226_s0 + $0x8] sm:$0xf]  ;;  %v845_v60 = vld [vmem:[%s1226_s0 + $0x4] sm:$0xf]  ;;  %v621_v61 = vld [vmem:[%s1226_s0 + $0x14] sm:$0xf0] }
  0x13   :  { %448 = vmatpush.bf16.msra.mxu0 %v868_v8  ;;  %535 = vmatpush.bf16.msra.mxu3 %v892_v9  ;;  %v628_v59 = vor.u32 %v848_v58, %v627_v57  ;;  %v655_v62 = vld [vmem:[%s1226_s0 + $0x38] sm:$0xf]  ;;  %v624_v63 = vor.u32 %v845_v60, %v621_v61  ;;  %v854_v0 = vld [vmem:[%s1226_s0 + $0x48] sm:$0xf0]  ;;  %v856_v1 = vld [vmem:[%s1226_s0 + $0x5c] sm:$0xf] }
  0x14   :  { %v669_v2 = vld [vmem:[%s1226_s0 + $0x6c] sm:$0xf0]  ;;  %v656_v3 = vor.u32 %v854_v0, %v655_v62  ;;  %v853_v6 = vld [vmem:[%s1226_s0 + $0x40] sm:$0xf0]  ;;  %v850_v8 = vld [vmem:[%s1226_s0 + $0x2c] sm:$0xf] }
  0x15   :  { %v672_v4 = vor.u32 %v856_v1, %v669_v2  ;;  %v647_v5 = vld [vmem:[%s1226_s0 + $0x30] sm:$0xf]  ;;  %v641_v9 = vld [vmem:[%s1226_s0 + $0x3c] sm:$0xf0]  ;;  %v667_v17 = vld [vmem:[%s1226_s0 + $0x58] sm:$0xf] }
  0x16   :  { %934 = vmatpush.bf16.msra.mxu1 %v867_v10  ;;  %935 = vmatpush.bf16.msra.mxu2 %v867_v10  ;;  %v648_v7 = vor.u32 %v853_v6, %v647_v5  ;;  %v858_v18 = vld [vmem:[%s1226_s0 + $0x68] sm:$0xf0]  ;;  %v661_v21 = vld [vmem:[%s1226_s0 + $0x64] sm:$0xf0]  ;;  %v687_v26 = vld [vmem:[%s1226_s0 + $0x80] sm:$0xf] }
  0x17   :  { %449 = vmatpush.bf16.msra.mxu0 %v867_v10  ;;  %536 = vmatpush.bf16.msra.mxu3 %v891_v11  ;;  %v675_v10 = vld [vmem:[%s1226_s0 + $0x60] sm:$0xf]  ;;  %v644_v11 = vor.u32 %v850_v8, %v641_v9  ;;  %v863_v27 = vld [vmem:[%s1226_s0 + $0x90] sm:$0xf0] }
  0x1a   :  { %936 = vmatpush.bf16.msra.mxu1 %v866_v12  ;;  %937 = vmatpush.bf16.msra.mxu2 %v866_v12 }
  0x1b   :  { %450 = vmatpush.bf16.msra.mxu0 %v866_v12  ;;  %537 = vmatpush.bf16.msra.mxu3 %v890_v13  ;;  %v859_v12 = vld [vmem:[%s1226_s0 + $0x70] sm:$0xf0]  ;;  %v861_v13 = vld [vmem:[%s1226_s0 + $0x84] sm:$0xf] }
  0x1c   :  { %v676_v15 = vor.u32 %v859_v12, %v675_v10 }
  0x1e   :  { %938 = vmatpush.bf16.msra.mxu1 %v865_v14  ;;  %939 = vmatpush.bf16.msra.mxu2 %v865_v14 }
  0x1f   :  { %451 = vmatpush.bf16.msra.mxu0 %v865_v14  ;;  %538 = vmatpush.bf16.msra.mxu3 %v889_v22  ;;  %v689_v14 = vld [vmem:[%s1226_s0 + $0x94] sm:$0xf0] }
  0x20   :  { %v692_v16 = vor.u32 %v861_v13, %v689_v14 }
  0x21   :  { %457 = vmatmul.bf16.vlgmr.msra.gmra.mxu1 %v640_v23  ;;  %467 = vmatmul.bf16.vlgmr.msra.gmra.mxu2 %v680_v24  ;;  %v695_v23 = vld [vmem:[%s1226_s0 + $0x88] sm:$0xf]  ;;  %v864_v24 = vld [vmem:[%s1226_s0 + $0x98] sm:$0xf0] }
  0x22   :  { %502 = vmatpush.bf16.msrb.mxu2 %v888_v19  ;;  %473 = vmatpush.bf16.msrb.mxu1 %v880_v20  ;;  %v668_v19 = vor.u32 %v858_v18, %v667_v17  ;;  %v855_v20 = vld [vmem:[%s1226_s0 + $0x54] sm:$0xf]  ;;  %v696_v25 = vor.u32 %v864_v24, %v695_v23 }
  0x23   :  { %564 = vmatpush.bf16.msrb.mxu0 %v900_v28  ;;  %539 = vmatmul.bf16.vlgmr.msra.gmra.mxu3 %v632_v32  ;;  %v664_v22 = vor.u32 %v855_v20, %v661_v21  ;;  %v688_v28 = vor.u32 %v863_v27, %v687_v26 }
  0x24   :  { %452 = vmatmul.bf16.vlgmr.msra.gmra.mxu0 %v620_v31 }
  0x26   :  { %503 = vmatpush.bf16.msrb.mxu2 %v887_v29  ;;  %474 = vmatpush.bf16.msrb.mxu1 %v879_v30  ;;  %v860_v29 = vld [vmem:[%s1226_s0 + $0x7c] sm:$0xf]  ;;  %v681_v30 = vld [vmem:[%s1226_s0 + $0x8c] sm:$0xf0] }
  0x27   :  { %565 = vmatpush.bf16.msrb.mxu0 %v899_v33  ;;  %v684_v31 = vor.u32 %v860_v29, %v681_v30 }
  0x2a   :  { %504 = vmatpush.bf16.msrb.mxu2 %v886_v34  ;;  %475 = vmatpush.bf16.msrb.mxu1 %v878_v35 }
  0x2b   :  { %566 = vmatpush.bf16.msrb.mxu0 %v898_v36 }
  0x2e   :  { %505 = vmatpush.bf16.msrb.mxu2 %v885_v37  ;;  %476 = vmatpush.bf16.msrb.mxu1 %v877_v38 }
  0x2f   :  { %567 = vmatpush.bf16.msrb.mxu0 %v897_v41 }
  0x31   :  { %462 = vmatmul.bf16.gmra.mxu1 %v660_v45 }
  0x32   :  { %506 = vmatpush.bf16.msrb.mxu2 %v884_v42  ;;  %477 = vmatpush.bf16.msrb.mxu1 %v876_v43  ;;  %v1200_v42 = vld [vmem:[%s1225_s2] ss:$0 sm:$0xff] }
  0x33   :  { %544 = vmatmul.bf16.gmra.mxu3 %v652_v52 }
  0x34   :  { %841 = vmatmul.msk.bf16.vlgmr.msrb.gmra.mxu0 %vm431_vm0, %v636_v51 }
  0x36   :  { %507 = vmatpush.bf16.msrb.mxu2 %v883_v49  ;;  %478 = vmatpush.bf16.msrb.mxu1 %v875_v50 }
  0x3a   :  { %508 = vmatpush.bf16.msrb.mxu2 %v882_v53  ;;  %479 = vmatpush.bf16.msrb.mxu1 %v874_v54 }
  0x3e   :  { %509 = vmatpush.bf16.msrb.mxu2 %v881_v55  ;;  %480 = vmatpush.bf16.msrb.mxu1 %v873_v56 }
  0x41   :  { %510 = vmatmul.bf16.vlgmr.msrb.gmra.mxu2 %v628_v59  ;;  %481 = vmatmul.bf16.vlgmr.msrb.gmra.mxu1 %v624_v63 }
  0x43   :  { %549 = vmatmul.bf16.gmra.mxu3 %v672_v4 }
  0x44   :  { %842 = vmatmul.msk.bf16.gmra.mxu0 %vm431_vm0, %v656_v3 }
  0x51   :  { %515 = vmatmul.bf16.gmra.mxu2 %v648_v7  ;;  %486 = vmatmul.bf16.gmra.mxu1 %v644_v11 }
  0x53   :  { %554 = vmatmul.bf16.gmra.mxu3 %v692_v16 }
  0x54   :  { %843 = vmatmul.msk.bf16.gmra.mxu0 %vm431_vm0, %v676_v15 }
  0x61   :  { %520 = vmatmul.bf16.gmra.mxu2 %v668_v19  ;;  %491 = vmatmul.bf16.gmra.mxu1 %v664_v22 }
  0x64   :  { %844 = vmatmul.msk.bf16.gmra.mxu0 %vm431_vm0, %v696_v25 }
  0x71   :  { %525 = vmatmul.bf16.gmra.mxu2 %v688_v28  ;;  %496 = vmatmul.bf16.gmra.mxu1 %v684_v31 }
  0x9e   :  { %v458_v32 = vpop.f32.mrf.mxu1 }
  0x9f   :  { %v459_v60 = vadd.f32 %v1200_v42, %v458_v32 }
  0xa1   :  { %v453_v33 = vpop.f32.mrf.mxu0 }
  0xa2   :  { %v454_v43 = vadd.f32 %v1200_v42, %v453_v33 }
  0xa4   :  { %v1193_v37 = vpop.f32.mrf.mxu2 }
  0xa6   :  { %v460_v34 = vpop.f32.mrf.mxu1  ;;  %v540_v38 = vpop.f32.mrf.mxu3 }
  0xa7   :  { %v461_v6 = vadd.f32 %v1200_v42, %v460_v34 }
  0xa9   :  { %v455_v35 = vpop.f32.mrf.mxu0 }
  0xaa   :  { %v456_v50 = vadd.f32 %v1200_v42, %v455_v35 }
  0xac   :  { %v1195_v41 = vpop.f32.mrf.mxu2 }
  0xae   :  { %v463_v36 = vpop.f32.mrf.mxu1  ;;  %v542_v45 = vpop.f32.mrf.mxu3 }
  0xaf   :  { %v464_v16 = vadd.f32 %v1200_v42, %v463_v36  ;;  %v469_v36 = vadd.f32 %v1200_v42, %v1193_v37 }
  0xb1   :  { %v569_v40 = vpop.f32.mrf.mxu0 }
  0xb6   :  { %v465_v39 = vpop.f32.mrf.mxu1  ;;  %v545_v55 = vpop.f32.mrf.mxu3 }
  0xb7   :  { %v466_v26 = vadd.f32 %v1200_v42, %v465_v39 }
  0xb9   :  { %v571_v48 = vpop.f32.mrf.mxu0 }
  0xbe   :  { %v482_v44 = vpop.f32.mrf.mxu1  ;;  %v547_v4 = vpop.f32.mrf.mxu3 }
  0xbf   :  { %v483_v46 = vadd.f32 %v482_v44, %v454_v43 }
  0xc1   :  { %v574_v57 = vpop.f32.mrf.mxu0 }
  0xc4   :  { %v511_v47 = vpop.f32.mrf.mxu2 }
  0xc5   :  { %v512_v49 = vadd.f32 %v511_v47, %v483_v46 }
  0xc6   :  { %v484_v51 = vpop.f32.mrf.mxu1  ;;  %v550_v15 = vpop.f32.mrf.mxu3 }
  0xc7   :  { %v485_v52 = vadd.f32 %v484_v51, %v456_v50  ;;  %v541_v53 = vadd.f32 %v540_v38, %v512_v49  ;;  %v471_v50 = vadd.f32 %v1200_v42, %v1195_v41 }
  0xc9   :  { %v570_v58 = vadd.f32 %v569_v40, %v541_v53  ;;  %v576_v7 = vpop.f32.mrf.mxu0 }
  0xcb   :  { %v589_v63 = vmax.f32 %v570_v58, 0.0 }
  0xcc   :  { %v513_v54 = vpop.f32.mrf.mxu2 }
  0xcd   :  { %v514_v56 = vadd.f32 %v513_v54, %v485_v52 }
  0xce   :  { %v487_v62 = vpop.f32.mrf.mxu1  ;;  %v552_v28 = vpop.f32.mrf.mxu3 }
  0xcf   :  { %v543_v59 = vadd.f32 %v542_v45, %v514_v56  ;;  %v488_v1 = vadd.f32 %v487_v62, %v459_v60 }
  0xd1   :  { %v572_v61 = vadd.f32 %v571_v48, %v543_v59  ;;  %v579_v19 = vpop.f32.mrf.mxu0 }
  0xd3   :  { %v590_v0 = vmax.f32 %v572_v61, 0.0 }
  0xd4   :  { %v516_v2 = vpop.f32.mrf.mxu2 }
  0xd5   :  { %v904_v3 = vpack.c.bf16 %v590_v0, %v589_v63  ;;  %v517_v5 = vadd.f32 %v516_v2, %v488_v1 }
  0xd6   :  { %v489_v8 = vpop.f32.mrf.mxu1  ;;  %v555_v46 = vpop.f32.mrf.mxu3 }
  0xd7   :  { %905 = vst [vmem:[%s1227_s3] sm:$0xff] %v904_v3   ;;  %v490_v9 = vadd.f32 %v489_v8, %v461_v6  ;;  %v546_v10 = vadd.f32 %v545_v55, %v517_v5 }
  0xd9   :  { %v575_v13 = vadd.f32 %v574_v57, %v546_v10  ;;  %v581_v31 = vpop.f32.mrf.mxu0 }
  0xdb   :  { %v591_v20 = vmax.f32 %v575_v13, 0.0 }
  0xdc   :  { %v518_v11 = vpop.f32.mrf.mxu2 }
  0xdd   :  { %v519_v12 = vadd.f32 %v518_v11, %v490_v9 }
  0xde   :  { %v492_v18 = vpop.f32.mrf.mxu1  ;;  %v557_v55 = vpop.f32.mrf.mxu3 }
  0xdf   :  { %v548_v14 = vadd.f32 %v547_v4, %v519_v12  ;;  %v493_v22 = vadd.f32 %v492_v18, %v464_v16 }
  0xe1   :  { %v577_v17 = vadd.f32 %v576_v7, %v548_v14  ;;  %v584_v48 = vpop.f32.mrf.mxu0 }
  0xe3   :  { %v592_v21 = vmax.f32 %v577_v17, 0.0 }
  0xe4   :  { %v521_v23 = vpop.f32.mrf.mxu2 }
  0xe5   :  { %v909_v24 = vpack.c.bf16 %v592_v21, %v591_v20  ;;  %v522_v25 = vadd.f32 %v521_v23, %v493_v22 }
  0xe6   :  { %v494_v27 = vpop.f32.mrf.mxu1 }
  0xe7   :  { %921 = vst [vmem:[%s1227_s3 + $0x8] sm:$0xff] %v909_v24   ;;  %v495_v29 = vadd.f32 %v494_v27, %v466_v26  ;;  %v551_v30 = vadd.f32 %v550_v15, %v522_v25 }
  0xe9   :  { %v580_v34 = vadd.f32 %v579_v19, %v551_v30  ;;  %v586_v58 = vpop.f32.mrf.mxu0 }
  0xeb   :  { %v593_v43 = vmax.f32 %v580_v34, 0.0 }
  0xec   :  { %v523_v32 = vpop.f32.mrf.mxu2 }
  0xed   :  { %v524_v33 = vadd.f32 %v523_v32, %v495_v29 }
  0xee   :  { %v497_v40 = vpop.f32.mrf.mxu1 }
  0xef   :  { %v553_v35 = vadd.f32 %v552_v28, %v524_v33  ;;  %v498_v45 = vadd.f32 %v497_v40, %v469_v36 }
  0xf1   :  { %v582_v38 = vadd.f32 %v581_v31, %v553_v35 }
  0xf3   :  { %v594_v44 = vmax.f32 %v582_v38, 0.0 }
  0xf4   :  { %v526_v47 = vpop.f32.mrf.mxu2 }
  0xf5   :  { %v914_v39 = vpack.c.bf16 %v594_v44, %v593_v43  ;;  %v527_v49 = vadd.f32 %v526_v47, %v498_v45 }
  0xf6   :  { %v499_v51 = vpop.f32.mrf.mxu1 }
  0xf7   :  { %922 = vst [vmem:[%s1227_s3 + $0x10] sm:$0xff] %v914_v39   ;;  %v500_v52 = vadd.f32 %v499_v51, %v471_v50  ;;  %v556_v37 = vadd.f32 %v555_v46, %v527_v49 }
  0xf9   :  { %v585_v56 = vadd.f32 %v584_v48, %v556_v37 }
  0xfb   :  { %v595_v60 = vmax.f32 %v585_v56, 0.0 }
  0xfc   :  { %v528_v53 = vpop.f32.mrf.mxu2 }
  0xfd   :  { %v529_v54 = vadd.f32 %v528_v53, %v500_v52 }
  0xff   :  { %v558_v57 = vadd.f32 %v557_v55, %v529_v54 }
 0x101   :  { %v587_v59 = vadd.f32 %v586_v58, %v558_v57 }
 0x103   :  { %v596_v61 = vmax.f32 %v587_v59, 0.0 }
 0x105   :  { %v919_v62 = vpack.c.bf16 %v596_v61, %v595_v60 }
 0x107   :  { %923 = vst [vmem:[%s1227_s3 + $0x18] sm:$0xff] %v919_v62  }

</bundles_post_ra>
